<compile_context>
chip_gen: v7x
topology: tpu7x:2x2x1
jax: 0.10.0
libtpu: 0.0.40
codegen_flags: <defaults>
</compile_context>

<pallas_src>
import functools

import numpy as np
import jax
import jax.numpy as jnp
from jax.experimental import pallas as pl
from jax.experimental.pallas import tpu as pltpu

EPS = 1e-5  # BatchNorm eps (PyTorch default)


def _r8(n):
    return ((n + 7) // 8) * 8


def _rup(n, m):
    return ((n + m - 1) // m) * m


# ----------------------- host-side DFT matrix builders ----------------------

def _rfft2_mats(h, w):
    """Dense 'ortho' rfft2 / irfft2 matrices over a flattened (h, w) block.

    Spectral index s = v * (w//2+1) + u, spatial index p = y * w + x.
      forward : Z[s]   = sum_p (df_r[s,p] + i*df_i[s,p]) * x[p]    == rfft2(x)
      inverse : out[p] = sum_s di_r[p,s]*Zr[s] + di_i[p,s]*Zi[s]   == irfftn(Z)
    The inverse carries the Hermitian alpha-weights, i.e. exactly what irfftn
    does with a (possibly non-Hermitian) half-spectrum.
    """
    wf = w // 2 + 1
    v = np.repeat(np.arange(h), wf)[:, None]          # (S, 1)
    u = np.tile(np.arange(wf), h)[:, None]            # (S, 1)
    y = np.repeat(np.arange(h), w)[None, :]           # (1, P)
    x = np.tile(np.arange(w), h)[None, :]              # (1, P)
    psi = 2.0 * np.pi * (v * y / h + u * x / w)        # (S, P)
    norm = 1.0 / np.sqrt(h * w)
    df_r = np.cos(psi) * norm
    df_i = -np.sin(psi) * norm
    alpha = np.where((u == 0) | ((w % 2 == 0) & (u == w // 2)), 1.0, 2.0)
    di_r = (alpha * np.cos(psi) * norm).T              # (P, S)
    di_i = (-(alpha * np.sin(psi)) * norm).T           # (P, S)
    return (df_r.astype(np.float32), df_i.astype(np.float32),
            di_r.astype(np.float32), di_i.astype(np.float32))


# ------------------------------- fused kernel --------------------------------

def _ffc_kernel(xlg_ref, w_ref, bn_ref, wri_ref,
                df_ref, di_ref, ldf_ref, ldi_ref,
                out_l_ref, out_g_ref,
                *, B, out_cl, out_cg, half, S1, S2, w_offs, bn_offs):
    P1 = df_ref.shape[0] // 2           # spatial positions per batch item (H*W)
    S1p = df_ref.shape[1]               # padded main-FU spectral size
    S2p = ldf_ref.shape[1]              # padded LFU spectral size
    BL = B * P1                         # batch folded into lanes
    co = half                           # FourierUnit output channels
    oU, oC2 = w_offs                    # row offsets inside the packed weights
    bL, b1, bFU, bLFU, bG = bn_offs     # row offsets inside the packed BN table
    rA = _r8(out_cl)
    rB = rA + _r8(half)

    def dot(a, b):
        return jnp.dot(a, b, preferred_element_type=jnp.float32)

    def bdot(a, b):
        # bf16 MXU operands, f32 accumulation (b is already bf16).
        return jnp.dot(a.astype(jnp.bfloat16), b, preferred_element_type=jnp.float32)

    BN = bn_ref[...]

    def bn_relu(z, off, c, count):
        # torch training-mode BatchNorm (biased variance, single pass) + ReLU.
        # `count` is the TRUE element count; padded lanes of z are exactly zero
        # and therefore contribute nothing to either sum.
        g = BN[off:off + c, 0:1]
        beta = BN[off:off + c, 1:2]
        inv_n = 1.0 / count
        mean = jnp.sum(z, axis=1, keepdims=True) * inv_n
        msq = jnp.sum(z * z, axis=1, keepdims=True) * inv_n
        var = msq - mean * mean
        scale = g * jax.lax.rsqrt(var + EPS)
        shift = beta - mean * scale
        return jnp.maximum(z * scale + shift, 0.0)

    XLG = xlg_ref[...]                  # (in_cl+in_cg, BL) f32
    W = w_ref[...]                      # packed f32 weights
    WRI = wri_ref[...]                  # (2*co, 2*P1) f32 LFU lane weight map
    DF = df_ref[...]                    # (2*P1, S1p)  bf16
    DI = di_ref[...]                    # (2*S1p, P1)  bf16
    LDF = ldf_ref[...]                  # (2*P1, S2p)  bf16
    LDI = ldi_ref[...]                  # (2*S2p, P1)  bf16

    # ---- stage 1: convl2l+convg2l, conv1, convl2g in ONE matmul -------------
    Z = dot(W[0:oU, :], XLG)                                     # (oU, BL)
    out_l_ref[...] = bn_relu(Z[0:out_cl, :], bL, out_cl, BL)      # local branch done
    XH = bn_relu(Z[rA:rA + half, :], b1, half, BL)                # (half, BL)
    ZG1 = Z[rB:rB + out_cg, :]                                    # convl2g(x_l)

    # ---- main FourierUnit: conv/DFT commutativity ---------------------------
    # U rows [0:2co)   = fu_w[:, :half] @ XH   (real-input weights)
    #   rows [2co:4co) = fu_w[:, half:] @ XH   (imag-input weights)
    U = dot(W[oU:oU + 4 * half, 0:half], XH)                      # (4co, BL)
    y1 = []
    for b in range(B):
        s = slice(b * P1, (b + 1) * P1)
        ub = jnp.concatenate([U[0:2 * co, s], U[2 * co:4 * co, s]], axis=1)   # (2co, 2*P1)
        y1.append(bdot(ub, DF))                                   # (2co, S1p), pad cols == 0
    Y1 = jnp.concatenate(y1, axis=1)                              # (2co, B*S1p)
    Y1 = bn_relu(Y1, bFU, 2 * co, B * S1)
    fu = []
    for b in range(B):
        s = slice(b * S1p, (b + 1) * S1p)
        yc = jnp.concatenate([Y1[0:co, s], Y1[co:2 * co, s]], axis=1)         # (co, 2*S1p)
        fu.append(bdot(yc, DI))                                   # (co, P1), real output
    FU = jnp.concatenate(fu, axis=1)                              # (co, BL)

    # ---- LFU: quadrant split + channel conv folded into WRI/LDF -------------
    y2 = []
    for b in range(B):
        s = slice(b * P1, (b + 1) * P1)
        xh0 = XH[0:1, s]                                          # (1, P1) (xh[:, :c//4])
        v = jnp.concatenate([xh0, xh0], axis=1) * WRI             # (2co, 2*P1)
        y2.append(bdot(v, LDF))                                   # (2co, S2p), pad cols == 0
    Y2 = jnp.concatenate(y2, axis=1)                              # (2co, B*S2p)
    Y2 = bn_relu(Y2, bLFU, 2 * co, B * S2)
    xs = []
    for b in range(B):
        s = slice(b * S2p, (b + 1) * S2p)
        yc = jnp.concatenate([Y2[0:co, s], Y2[co:2 * co, s]], axis=1)         # (co, 2*S2p)
        xs.append(bdot(yc, LDI))                                  # (co, P1), 2x2-tiled output
    XS = jnp.concatenate(xs, axis=1)                              # (co, BL)

    # ---- global branch: convl2g(x_l) + conv2(xh + fu + lfu) -> BN_g -> ReLU --
    ZG = ZG1 + dot(W[oC2:oC2 + out_cg, 0:half], XH + FU + XS)     # (out_cg, BL)
    out_g_ref[...] = bn_relu(ZG, bG, out_cg, BL)


# -------------------------------- wrapper ------------------------------------

def _full_spec(a):
    nd = a.ndim
    return pl.BlockSpec(tuple(a.shape), lambda i, _n=nd: (0,) * _n)


def ffc_bn_act_forward(x_l, x_g, p):
    B, in_cl, H, W = x_l.shape
    in_cg = x_g.shape[1]
    out_cl = p["w_l2l"].shape[0]
    out_cg = p["w_l2g"].shape[0]
    half = p["st_conv1_w"].shape[0]
    assert H % 2 == 0 and W % 2 == 0 and half <= in_cl + in_cg
    P1 = H * W
    S1 = H * (W // 2 + 1)
    h2, w2 = H // 2, W // 2
    S2 = h2 * (w2 // 2 + 1)
    S1p = _rup(S1, 128)
    S2p = _rup(S2, 128)
    BL = B * P1
    # Dense-DFT constants scale as (H*W)^2; guard before they blow VMEM (v7x: 64 MiB).
    assert 2 * (2 * P1) * (S1p + P1) <= 8 << 20, "use separable DFT + batch-tiled grid"

    # --- DFT constants (numpy, baked at trace time); real/imag K-concatenated,
    #     spectral axis zero-padded to a lane multiple ---
    dfr1, dfi1, dir1, dii1 = _rfft2_mats(H, W)
    DF = np.zeros((2 * P1, S1p), np.float32)
    DF[:P1, :S1] = dfr1.T
    DF[P1:, :S1] = dfi1.T
    DI = np.zeros((2 * S1p, P1), np.float32)
    DI[:S1, :] = dir1.T
    DI[S1p:S1p + S1, :] = dii1.T

    dfr2, dfi2, dir2, dii2 = _rfft2_mats(h2, w2)
    ys, xs_ = np.meshgrid(np.arange(H), np.arange(W), indexing="ij")
    # LFU quadrant id per global position (torch cat order: TL, BL, TR, BR)
    qflat = ((ys >= h2).astype(np.int64) + 2 * (xs_ >= w2).astype(np.int64)).reshape(-1)
    # local index inside the quadrant == index used by the 2x2 tiling repeat
    locflat = ((ys % h2) * w2 + (xs_ % w2)).reshape(-1)
    LDF = np.zeros((2 * P1, S2p), np.float32)        # dense: every row is used
    LDF[:P1, :S2] = dfr2.T[locflat]
    LDF[P1:, :S2] = dfi2.T[locflat]
    LDI = np.zeros((2 * S2p, P1), np.float32)        # 2x2 tile folded in
    LDI[:S2, :] = dir2[locflat, :].T
    LDI[S2p:S2p + S2, :] = dii2[locflat, :].T

    # --- activations: channel-major, batch folded into the lane axis ---------
    xl2 = jnp.transpose(x_l, (1, 0, 2, 3)).reshape(in_cl, BL).astype(jnp.float32)
    xg2 = jnp.transpose(x_g, (1, 0, 2, 3)).reshape(in_cg, BL).astype(jnp.float32)
    XLG = jnp.concatenate([xl2, xg2], axis=0)

    # --- pack all 1x1-conv weights into one array (one DMA) ------------------
    rA = _r8(out_cl)
    rB = rA + _r8(half)
    oU = rB + _r8(out_cg)
    oC2 = oU + _r8(4 * half)
    n_rows = oC2 + _r8(out_cg)
    n_cols = in_cl + in_cg
    Wp = jnp.zeros((n_rows, n_cols), jnp.float32)
    Wp = Wp.at[0:out_cl, 0:in_cl].set(p["w_l2l"])
    Wp = Wp.at[0:out_cl, in_cl:in_cl + in_cg].set(p["w_g2l"])
    Wp = Wp.at[rA:rA + half, in_cl:in_cl + in_cg].set(p["st_conv1_w"])
    Wp = Wp.at[rB:rB + out_cg, 0:in_cl].set(p["w_l2g"])
    Wp = Wp.at[oU:oU + 2 * half, 0:half].set(p["fu_w"][:, :half])
    Wp = Wp.at[oU + 2 * half:oU + 4 * half, 0:half].set(p["fu_w"][:, half:])
    Wp = Wp.at[oC2:oC2 + out_cg, 0:half].set(p["st_conv2_w"])

    # --- pack the five BN gamma/beta tables into one array (one DMA) ---------
    bL = 0
    b1 = bL + _r8(out_cl)
    bFU = b1 + _r8(half)
    bLFU = bFU + _r8(2 * half)
    bG = bLFU + _r8(2 * half)
    n_bn = bG + _r8(out_cg)
    BNp = jnp.zeros((n_bn, 2), jnp.float32)

    def put(a, off, g, b):
        a = a.at[off:off + g.shape[0], 0].set(g)
        return a.at[off:off + b.shape[0], 1].set(b)

    BNp = put(BNp, bL, p["bn_l_g"], p["bn_l_b"])
    BNp = put(BNp, b1, p["st_bn1_g"], p["st_bn1_b"])
    BNp = put(BNp, bFU, p["fu_bn_g"], p["fu_bn_b"])
    BNp = put(BNp, bLFU, p["lfu_bn_g"], p["lfu_bn_b"])
    BNp = put(BNp, bG, p["bn_g_g"], p["bn_g_b"])

    # --- LFU per-lane weight map: folds the quadrant split + lfu conv weights
    WRI = jnp.concatenate([p["lfu_w"][:, :half][:, qflat],
                           p["lfu_w"][:, half:][:, qflat]], axis=1).astype(jnp.float32)

    bf = jnp.bfloat16
    inputs = (XLG, Wp, BNp, WRI,
              jnp.asarray(DF, bf), jnp.asarray(DI, bf),
              jnp.asarray(LDF, bf), jnp.asarray(LDI, bf))

    kern = functools.partial(
        _ffc_kernel, B=B, out_cl=out_cl, out_cg=out_cg, half=half,
        S1=S1, S2=S2, w_offs=(oU, oC2), bn_offs=(bL, b1, bFU, bLFU, bG))

    out_l2, out_g2 = pl.pallas_call(
        kern,
        grid=(1,),
        in_specs=[_full_spec(a) for a in inputs],
        out_specs=(pl.BlockSpec((out_cl, BL), lambda i: (0, 0)),
                   pl.BlockSpec((out_cg, BL), lambda i: (0, 0))),
        out_shape=(jax.ShapeDtypeStruct((out_cl, BL), jnp.float32),
                   jax.ShapeDtypeStruct((out_cg, BL), jnp.float32)),
        compiler_params=pltpu.CompilerParams(dimension_semantics=("arbitrary",)),
    )(*inputs)

    out_l = out_l2.reshape(out_cl, B, H, W).transpose(1, 0, 2, 3)
    out_g = out_g2.reshape(out_cg, B, H, W).transpose(1, 0, 2, 3)
    return out_l, out_g


# ------------------------- parameter initialization --------------------------

def init_params(key, in_channels, out_channels, ratio_gin, ratio_gout):
    in_cg = int(in_channels * ratio_gin)
    in_cl = in_channels - in_cg
    out_cg = int(out_channels * ratio_gout)
    out_cl = out_channels - out_cg
    half = out_cg // 2
    ks = jax.random.split(key, 7)

    def w(k, o, i):  # (Cout, Cin) torch-layout 1x1 conv weight
        return jax.random.normal(k, (o, i), jnp.float32) / np.sqrt(i)

    return {
        "w_l2l": w(ks[0], out_cl, in_cl),
        "w_g2l": w(ks[1], out_cl, in_cg),
        "w_l2g": w(ks[2], out_cg, in_cl),
        "st_conv1_w": w(ks[3], half, in_cg),
        "st_bn1_g": jnp.ones((half,), jnp.float32),
        "st_bn1_b": jnp.zeros((half,), jnp.float32),
        "fu_w": w(ks[4], 2 * half, 2 * half),
        "fu_bn_g": jnp.ones((2 * half,), jnp.float32),
        "fu_bn_b": jnp.zeros((2 * half,), jnp.float32),
        "lfu_w": w(ks[5], 2 * half, 2 * half),
        "lfu_bn_g": jnp.ones((2 * half,), jnp.float32),
        "lfu_bn_b": jnp.zeros((2 * half,), jnp.float32),
        "st_conv2_w": w(ks[6], out_cg, half),
        "bn_l_g": jnp.ones((out_cl,), jnp.float32),
        "bn_l_b": jnp.zeros((out_cl,), jnp.float32),
        "bn_g_g": jnp.ones((out_cg,), jnp.float32),
        "bn_g_b": jnp.zeros((out_cg,), jnp.float32),
    }


# ---------------------- pure-JAX reference (validation) ----------------------

def _bn_relu_ref(x, g, b):
    mu = x.mean(axis=(0, 2, 3), keepdims=True)
    var = jnp.square(x - mu).mean(axis=(0, 2, 3), keepdims=True)
    y = (x - mu) / jnp.sqrt(var + EPS)
    return jnp.maximum(y * g.reshape(1, -1, 1, 1) + b.reshape(1, -1, 1, 1), 0.0)


def _conv1x1_ref(x, wmat):
    return jnp.einsum("oc,bchw->bohw", wmat, x, precision="highest")


def _fourier_unit_ref(x, wmat, g, b):
    _, _, h, w = x.shape
    f = jnp.fft.rfftn(x, s=(h, w), axes=(2, 3), norm="ortho")
    ff = jnp.concatenate([f.real, f.imag], axis=1)
    ff = _bn_relu_ref(_conv1x1_ref(ff, wmat), g, b)
    co = wmat.shape[0] // 2
    fc = ff[:, :co] + 1j * ff[:, co:]
    return jnp.fft.irfftn(fc, s=(h, w), axes=(2, 3), norm="ortho")


def ffc_bn_act_ref(x_l, x_g, p):
    out_l = _conv1x1_ref(x_l, p["w_l2l"]) + _conv1x1_ref(x_g, p["w_g2l"])
    out_l = _bn_relu_ref(out_l, p["bn_l_g"], p["bn_l_b"])
    xh = _bn_relu_ref(_conv1x1_ref(x_g, p["st_conv1_w"]), p["st_bn1_g"], p["st_bn1_b"])
    fu = _fourier_unit_ref(xh, p["fu_w"], p["fu_bn_g"], p["fu_bn_b"])
    c, h = xh.shape[1], xh.shape[2]
    xs = xh[:, : c // 4]
    xs = jnp.concatenate(jnp.split(xs, [h // 2], axis=2), axis=1)
    xs = jnp.concatenate(jnp.split(xs, [h // 2], axis=3), axis=1)
    xs = _fourier_unit_ref(xs, p["lfu_w"], p["lfu_bn_g"], p["lfu_bn_b"])
    xs = jnp.tile(xs, (1, 1, 2, 2))
    st = _conv1x1_ref(xh + fu + xs, p["st_conv2_w"])
    out_g = _bn_relu_ref(_conv1x1_ref(x_l, p["w_l2g"]) + st, p["bn_g_g"], p["bn_g_b"])
    return out_l, out_g


# ------------------------------------ main ------------------------------------

if __name__ == "__main__":
    B, H, W = 2, 16, 16
    in_channels, out_channels = 8, 16
    ratio_gin = ratio_gout = 0.5
    in_cg = int(in_channels * ratio_gin)
    in_cl = in_channels - in_cg
    out_cg = int(out_channels * ratio_gout)
    out_cl = out_channels - out_cg

    key = jax.random.PRNGKey(0)
    k1, k2, kp = jax.random.split(key, 3)
    x_l = jax.random.normal(k1, (B, in_cl, H, W), jnp.float32)
    x_g = jax.random.normal(k2, (B, in_cg, H, W), jnp.float32)
    params = init_params(kp, in_channels, out_channels, ratio_gin, ratio_gout)

    fwd = jax.jit(ffc_bn_act_forward)
    out_l, out_g = fwd(x_l, x_g, params)
    jax.block_until_ready((out_l, out_g))

    assert out_l.shape == (B, out_cl, H, W)
    assert out_g.shape == (B, out_cg, H, W)

    # sanity check against a pure-JAX (jnp.fft based) reference of the torch forward;
    # tolerance covers the bf16 DFT constants (the local branch is exact f32).
    ref_l, ref_g = jax.jit(ffc_bn_act_ref)(x_l, x_g, params)
    ok = bool(jnp.allclose(out_l, ref_l, rtol=2e-2, atol=2e-2)
              and jnp.allclose(out_g, ref_g, rtol=2e-2, atol=2e-2))
    if ok:
        print("KERNEL_OK")
    else:
        print("MISMATCH",
              float(jnp.max(jnp.abs(out_l - ref_l))),
              float(jnp.max(jnp.abs(out_g - ref_g))))
</pallas_src>

<mosaic_0001>
module attributes {stable_mosaic.version = 11 : i64} {
  func.func @_ffc_kernel(%arg0: i32, %arg1: memref<8x512xf32, #tpu.memory_space<vmem>>, %arg2: memref<48x8xf32, #tpu.memory_space<vmem>>, %arg3: memref<40x2xf32, #tpu.memory_space<vmem>>, %arg4: memref<8x512xf32, #tpu.memory_space<vmem>>, %arg5: memref<512x256xbf16, #tpu.memory_space<vmem>>, %arg6: memref<512x256xbf16, #tpu.memory_space<vmem>>, %arg7: memref<512x128xbf16, #tpu.memory_space<vmem>>, %arg8: memref<256x256xbf16, #tpu.memory_space<vmem>>, %arg9: memref<8x512xf32, #tpu.memory_space<vmem>>, %arg10: memref<8x512xf32, #tpu.memory_space<vmem>>) attributes {dimension_semantics = [#tpu.dimension_semantics<arbitrary>], iteration_bounds = array<i64: 1>, scalar_prefetch = 0 : i64, scratch_operands = 0 : i64, tpu.core_type = #tpu.core_type<tc>, window_params = [{pipeline_mode = #tpu.pipeline_mode<synchronous>, transform_indices = @transform_0, window_bounds = array<i64: 8, 512>}, {pipeline_mode = #tpu.pipeline_mode<synchronous>, transform_indices = @transform_1, window_bounds = array<i64: 48, 8>}, {pipeline_mode = #tpu.pipeline_mode<synchronous>, transform_indices = @transform_2, window_bounds = array<i64: 40, 2>}, {pipeline_mode = #tpu.pipeline_mode<synchronous>, transform_indices = @transform_3, window_bounds = array<i64: 8, 512>}, {pipeline_mode = #tpu.pipeline_mode<synchronous>, transform_indices = @transform_4, window_bounds = array<i64: 512, 256>}, {pipeline_mode = #tpu.pipeline_mode<synchronous>, transform_indices = @transform_5, window_bounds = array<i64: 512, 256>}, {pipeline_mode = #tpu.pipeline_mode<synchronous>, transform_indices = @transform_6, window_bounds = array<i64: 512, 128>}, {pipeline_mode = #tpu.pipeline_mode<synchronous>, transform_indices = @transform_7, window_bounds = array<i64: 256, 256>}, {pipeline_mode = #tpu.pipeline_mode<synchronous>, transform_indices = @transform_8, window_bounds = array<i64: 8, 512>}, {pipeline_mode = #tpu.pipeline_mode<synchronous>, transform_indices = @transform_9, window_bounds = array<i64: 8, 512>}]} {
    %c0 = arith.constant 0 : index
    %c0_0 = arith.constant 0 : index
    %0 = vector.load %arg3[%c0, %c0_0] : memref<40x2xf32, #tpu.memory_space<vmem>>, vector<40x2xf32>
    %c0_1 = arith.constant 0 : index
    %c0_2 = arith.constant 0 : index
    %1 = vector.load %arg1[%c0_1, %c0_2] : memref<8x512xf32, #tpu.memory_space<vmem>>, vector<8x512xf32>
    %c0_3 = arith.constant 0 : index
    %c0_4 = arith.constant 0 : index
    %2 = vector.load %arg2[%c0_3, %c0_4] : memref<48x8xf32, #tpu.memory_space<vmem>>, vector<48x8xf32>
    %c0_5 = arith.constant 0 : index
    %c0_6 = arith.constant 0 : index
    %3 = vector.load %arg4[%c0_5, %c0_6] : memref<8x512xf32, #tpu.memory_space<vmem>>, vector<8x512xf32>
    %c0_7 = arith.constant 0 : index
    %c0_8 = arith.constant 0 : index
    %4 = vector.load %arg5[%c0_7, %c0_8] : memref<512x256xbf16, #tpu.memory_space<vmem>>, vector<512x256xbf16>
    %c0_9 = arith.constant 0 : index
    %c0_10 = arith.constant 0 : index
    %5 = vector.load %arg6[%c0_9, %c0_10] : memref<512x256xbf16, #tpu.memory_space<vmem>>, vector<512x256xbf16>
    %c0_11 = arith.constant 0 : index
    %c0_12 = arith.constant 0 : index
    %6 = vector.load %arg7[%c0_11, %c0_12] : memref<512x128xbf16, #tpu.memory_space<vmem>>, vector<512x128xbf16>
    %c0_13 = arith.constant 0 : index
    %c0_14 = arith.constant 0 : index
    %7 = vector.load %arg8[%c0_13, %c0_14] : memref<256x256xbf16, #tpu.memory_space<vmem>>, vector<256x256xbf16>
    %8 = vector.extract_strided_slice %2 {offsets = [0, 0], sizes = [24, 8], strides = [1, 1]} : vector<48x8xf32> to vector<24x8xf32>
    %cst = arith.constant dense<0.000000e+00> : vector<24x512xf32>
    %9 = tpu.matmul %8, %1, %cst {dimension_numbers = #tpu.dot_dimension_numbers<[1], [0], [0], [1], [0, 0, 1, 1], [], []>} : vector<24x8xf32>, vector<8x512xf32>, vector<24x512xf32> -> vector<24x512xf32>
    %10 = vector.extract_strided_slice %9 {offsets = [0, 0], sizes = [8, 512], strides = [1, 1]} : vector<24x512xf32> to vector<8x512xf32>
    %11 = vector.extract_strided_slice %0 {offsets = [0, 0], sizes = [8, 1], strides = [1, 1]} : vector<40x2xf32> to vector<8x1xf32>
    %12 = vector.extract_strided_slice %0 {offsets = [0, 1], sizes = [8, 1], strides = [1, 1]} : vector<40x2xf32> to vector<8x1xf32>
    %cst_15 = arith.constant dense<0.000000e+00> : vector<8xf32>
    %13 = vector.multi_reduction <add>, %10, %cst_15 [1] : vector<8x512xf32> to vector<8xf32>
    %14 = vector.shape_cast %13 : vector<8xf32> to vector<8x1xf32>
    %cst_16 = arith.constant 0.001953125 : f32
    %15 = vector.broadcast %cst_16 : f32 to vector<8x1xf32>
    %16 = arith.mulf %14, %15 : vector<8x1xf32>
    %17 = arith.mulf %10, %10 : vector<8x512xf32>
    %cst_17 = arith.constant dense<0.000000e+00> : vector<8xf32>
    %18 = vector.multi_reduction <add>, %17, %cst_17 [1] : vector<8x512xf32> to vector<8xf32>
    %19 = vector.shape_cast %18 : vector<8xf32> to vector<8x1xf32>
    %cst_18 = arith.constant 0.001953125 : f32
    %20 = vector.broadcast %cst_18 : f32 to vector<8x1xf32>
    %21 = arith.mulf %19, %20 : vector<8x1xf32>
    %22 = arith.mulf %16, %16 : vector<8x1xf32>
    %23 = arith.subf %21, %22 : vector<8x1xf32>
    %cst_19 = arith.constant 9.99999974E-6 : f32
    %24 = vector.broadcast %cst_19 : f32 to vector<8x1xf32>
    %25 = arith.addf %23, %24 : vector<8x1xf32>
    %26 = math.rsqrt %25 : vector<8x1xf32>
    %27 = arith.mulf %11, %26 : vector<8x1xf32>
    %28 = arith.mulf %16, %27 : vector<8x1xf32>
    %29 = arith.subf %12, %28 : vector<8x1xf32>
    %30 = vector.broadcast %27 : vector<8x1xf32> to vector<8x512xf32>
    %31 = arith.mulf %10, %30 : vector<8x512xf32>
    %32 = vector.broadcast %29 : vector<8x1xf32> to vector<8x512xf32>
    %33 = arith.addf %31, %32 : vector<8x512xf32>
    %cst_20 = arith.constant 0.000000e+00 : f32
    %34 = vector.broadcast %cst_20 : f32 to vector<8x512xf32>
    %35 = arith.maximumf %33, %34 : vector<8x512xf32>
    %c0_21 = arith.constant 0 : index
    %c0_22 = arith.constant 0 : index
    %36 = vector.load %arg9[%c0_21, %c0_22] : memref<8x512xf32, #tpu.memory_space<vmem>>, vector<8x512xf32>
    tpu.vector_store %arg9[%c0_21, %c0_22], %35 {strides = array<i32>} : memref<8x512xf32, #tpu.memory_space<vmem>>, vector<8x512xf32>,
    %37 = vector.extract_strided_slice %9 {offsets = [8, 0], sizes = [4, 512], strides = [1, 1]} : vector<24x512xf32> to vector<4x512xf32>
    %38 = vector.extract_strided_slice %0 {offsets = [8, 0], sizes = [4, 1], strides = [1, 1]} : vector<40x2xf32> to vector<4x1xf32>
    %39 = vector.extract_strided_slice %0 {offsets = [8, 1], sizes = [4, 1], strides = [1, 1]} : vector<40x2xf32> to vector<4x1xf32>
    %cst_23 = arith.constant dense<0.000000e+00> : vector<4xf32>
    %40 = vector.multi_reduction <add>, %37, %cst_23 [1] : vector<4x512xf32> to vector<4xf32>
    %41 = vector.shape_cast %40 : vector<4xf32> to vector<4x1xf32>
    %cst_24 = arith.constant 0.001953125 : f32
    %42 = vector.broadcast %cst_24 : f32 to vector<4x1xf32>
    %43 = arith.mulf %41, %42 : vector<4x1xf32>
    %44 = arith.mulf %37, %37 : vector<4x512xf32>
    %cst_25 = arith.constant dense<0.000000e+00> : vector<4xf32>
    %45 = vector.multi_reduction <add>, %44, %cst_25 [1] : vector<4x512xf32> to vector<4xf32>
    %46 = vector.shape_cast %45 : vector<4xf32> to vector<4x1xf32>
    %cst_26 = arith.constant 0.001953125 : f32
    %47 = vector.broadcast %cst_26 : f32 to vector<4x1xf32>
    %48 = arith.mulf %46, %47 : vector<4x1xf32>
    %49 = arith.mulf %43, %43 : vector<4x1xf32>
    %50 = arith.subf %48, %49 : vector<4x1xf32>
    %cst_27 = arith.constant 9.99999974E-6 : f32
    %51 = vector.broadcast %cst_27 : f32 to vector<4x1xf32>
    %52 = arith.addf %50, %51 : vector<4x1xf32>
    %53 = math.rsqrt %52 : vector<4x1xf32>
    %54 = arith.mulf %38, %53 : vector<4x1xf32>
    %55 = arith.mulf %43, %54 : vector<4x1xf32>
    %56 = arith.subf %39, %55 : vector<4x1xf32>
    %57 = vector.broadcast %54 : vector<4x1xf32> to vector<4x512xf32>
    %58 = arith.mulf %37, %57 : vector<4x512xf32>
    %59 = vector.broadcast %56 : vector<4x1xf32> to vector<4x512xf32>
    %60 = arith.addf %58, %59 : vector<4x512xf32>
    %cst_28 = arith.constant 0.000000e+00 : f32
    %61 = vector.broadcast %cst_28 : f32 to vector<4x512xf32>
    %62 = arith.maximumf %60, %61 : vector<4x512xf32>
    %63 = vector.extract_strided_slice %9 {offsets = [16, 0], sizes = [8, 512], strides = [1, 1]} : vector<24x512xf32> to vector<8x512xf32>
    %64 = vector.extract_strided_slice %2 {offsets = [24, 0], sizes = [16, 4], strides = [1, 1]} : vector<48x8xf32> to vector<16x4xf32>
    %cst_29 = arith.constant dense<0.000000e+00> : vector<16x512xf32>
    %65 = tpu.matmul %64, %62, %cst_29 {dimension_numbers = #tpu.dot_dimension_numbers<[1], [0], [0], [1], [0, 0, 1, 1], [], []>} : vector<16x4xf32>, vector<4x512xf32>, vector<16x512xf32> -> vector<16x512xf32>
    %66 = vector.extract_strided_slice %65 {offsets = [0, 0], sizes = [8, 256], strides = [1, 1]} : vector<16x512xf32> to vector<8x256xf32>
    %67 = vector.extract_strided_slice %65 {offsets = [8, 0], sizes = [8, 256], strides = [1, 1]} : vector<16x512xf32> to vector<8x256xf32>
    %68 = tpu.concatenate %66, %67 in 1 : vector<8x256xf32>, vector<8x256xf32> -> vector<8x512xf32>
    %69 = arith.truncf %68 : vector<8x512xf32> to vector<8x512xbf16>
    %cst_30 = arith.constant dense<0.000000e+00> : vector<8x256xf32>
    %70 = tpu.matmul %69, %4, %cst_30 {dimension_numbers = #tpu.dot_dimension_numbers<[1], [0], [0], [1], [0, 0, 1, 1], [], []>} : vector<8x512xbf16>, vector<512x256xbf16>, vector<8x256xf32> -> vector<8x256xf32>
    %71 = vector.extract_strided_slice %65 {offsets = [0, 256], sizes = [8, 256], strides = [1, 1]} : vector<16x512xf32> to vector<8x256xf32>
    %72 = vector.extract_strided_slice %65 {offsets = [8, 256], sizes = [8, 256], strides = [1, 1]} : vector<16x512xf32> to vector<8x256xf32>
    %73 = tpu.concatenate %71, %72 in 1 : vector<8x256xf32>, vector<8x256xf32> -> vector<8x512xf32>
    %74 = arith.truncf %73 : vector<8x512xf32> to vector<8x512xbf16>
    %cst_31 = arith.constant dense<0.000000e+00> : vector<8x256xf32>
    %75 = tpu.matmul %74, %4, %cst_31 {dimension_numbers = #tpu.dot_dimension_numbers<[1], [0], [0], [1], [0, 0, 1, 1], [], []>} : vector<8x512xbf16>, vector<512x256xbf16>, vector<8x256xf32> -> vector<8x256xf32>
    %76 = tpu.concatenate %70, %75 in 1 : vector<8x256xf32>, vector<8x256xf32> -> vector<8x512xf32>
    %77 = vector.extract_strided_slice %0 {offsets = [16, 0], sizes = [8, 1], strides = [1, 1]} : vector<40x2xf32> to vector<8x1xf32>
    %78 = vector.extract_strided_slice %0 {offsets = [16, 1], sizes = [8, 1], strides = [1, 1]} : vector<40x2xf32> to vector<8x1xf32>
    %cst_32 = arith.constant dense<0.000000e+00> : vector<8xf32>
    %79 = vector.multi_reduction <add>, %76, %cst_32 [1] : vector<8x512xf32> to vector<8xf32>
    %80 = vector.shape_cast %79 : vector<8xf32> to vector<8x1xf32>
    %cst_33 = arith.constant 0.00347222225 : f32
    %81 = vector.broadcast %cst_33 : f32 to vector<8x1xf32>
    %82 = arith.mulf %80, %81 : vector<8x1xf32>
    %83 = arith.mulf %76, %76 : vector<8x512xf32>
    %cst_34 = arith.constant dense<0.000000e+00> : vector<8xf32>
    %84 = vector.multi_reduction <add>, %83, %cst_34 [1] : vector<8x512xf32> to vector<8xf32>
    %85 = vector.shape_cast %84 : vector<8xf32> to vector<8x1xf32>
    %cst_35 = arith.constant 0.00347222225 : f32
    %86 = vector.broadcast %cst_35 : f32 to vector<8x1xf32>
    %87 = arith.mulf %85, %86 : vector<8x1xf32>
    %88 = arith.mulf %82, %82 : vector<8x1xf32>
    %89 = arith.subf %87, %88 : vector<8x1xf32>
    %cst_36 = arith.constant 9.99999974E-6 : f32
    %90 = vector.broadcast %cst_36 : f32 to vector<8x1xf32>
    %91 = arith.addf %89, %90 : vector<8x1xf32>
    %92 = math.rsqrt %91 : vector<8x1xf32>
    %93 = arith.mulf %77, %92 : vector<8x1xf32>
    %94 = arith.mulf %82, %93 : vector<8x1xf32>
    %95 = arith.subf %78, %94 : vector<8x1xf32>
    %96 = vector.broadcast %93 : vector<8x1xf32> to vector<8x512xf32>
    %97 = arith.mulf %76, %96 : vector<8x512xf32>
    %98 = vector.broadcast %95 : vector<8x1xf32> to vector<8x512xf32>
    %99 = arith.addf %97, %98 : vector<8x512xf32>
    %cst_37 = arith.constant 0.000000e+00 : f32
    %100 = vector.broadcast %cst_37 : f32 to vector<8x512xf32>
    %101 = arith.maximumf %99, %100 : vector<8x512xf32>
    %102 = vector.extract_strided_slice %101 {offsets = [0, 0], sizes = [4, 256], strides = [1, 1]} : vector<8x512xf32> to vector<4x256xf32>
    %103 = vector.extract_strided_slice %101 {offsets = [4, 0], sizes = [4, 256], strides = [1, 1]} : vector<8x512xf32> to vector<4x256xf32>
    %104 = tpu.concatenate %102, %103 in 1 : vector<4x256xf32>, vector<4x256xf32> -> vector<4x512xf32>
    %105 = arith.truncf %104 : vector<4x512xf32> to vector<4x512xbf16>
    %cst_38 = arith.constant dense<0.000000e+00> : vector<4x256xf32>
    %106 = tpu.matmul %105, %5, %cst_38 {dimension_numbers = #tpu.dot_dimension_numbers<[1], [0], [0], [1], [0, 0, 1, 1], [], []>} : vector<4x512xbf16>, vector<512x256xbf16>, vector<4x256xf32> -> vector<4x256xf32>
    %107 = vector.extract_strided_slice %101 {offsets = [0, 256], sizes = [4, 256], strides = [1, 1]} : vector<8x512xf32> to vector<4x256xf32>
    %108 = vector.extract_strided_slice %101 {offsets = [4, 256], sizes = [4, 256], strides = [1, 1]} : vector<8x512xf32> to vector<4x256xf32>
    %109 = tpu.concatenate %107, %108 in 1 : vector<4x256xf32>, vector<4x256xf32> -> vector<4x512xf32>
    %110 = arith.truncf %109 : vector<4x512xf32> to vector<4x512xbf16>
    %cst_39 = arith.constant dense<0.000000e+00> : vector<4x256xf32>
    %111 = tpu.matmul %110, %5, %cst_39 {dimension_numbers = #tpu.dot_dimension_numbers<[1], [0], [0], [1], [0, 0, 1, 1], [], []>} : vector<4x512xbf16>, vector<512x256xbf16>, vector<4x256xf32> -> vector<4x256xf32>
    %112 = tpu.concatenate %106, %111 in 1 : vector<4x256xf32>, vector<4x256xf32> -> vector<4x512xf32>
    %113 = vector.extract_strided_slice %62 {offsets = [0, 0], sizes = [1, 256], strides = [1, 1]} : vector<4x512xf32> to vector<1x256xf32>
    %114 = tpu.concatenate %113, %113 in 1 : vector<1x256xf32>, vector<1x256xf32> -> vector<1x512xf32>
    %115 = vector.broadcast %114 : vector<1x512xf32> to vector<8x512xf32>
    %116 = arith.mulf %115, %3 : vector<8x512xf32>
    %117 = arith.truncf %116 : vector<8x512xf32> to vector<8x512xbf16>
    %cst_40 = arith.constant dense<0.000000e+00> : vector<8x128xf32>
    %118 = tpu.matmul %117, %6, %cst_40 {dimension_numbers = #tpu.dot_dimension_numbers<[1], [0], [0], [1], [0, 0, 1, 1], [], []>} : vector<8x512xbf16>, vector<512x128xbf16>, vector<8x128xf32> -> vector<8x128xf32>
    %119 = vector.extract_strided_slice %62 {offsets = [0, 256], sizes = [1, 256], strides = [1, 1]} : vector<4x512xf32> to vector<1x256xf32>
    %120 = tpu.concatenate %119, %119 in 1 : vector<1x256xf32>, vector<1x256xf32> -> vector<1x512xf32>
    %121 = vector.broadcast %120 : vector<1x512xf32> to vector<8x512xf32>
    %122 = arith.mulf %121, %3 : vector<8x512xf32>
    %123 = arith.truncf %122 : vector<8x512xf32> to vector<8x512xbf16>
    %cst_41 = arith.constant dense<0.000000e+00> : vector<8x128xf32>
    %124 = tpu.matmul %123, %6, %cst_41 {dimension_numbers = #tpu.dot_dimension_numbers<[1], [0], [0], [1], [0, 0, 1, 1], [], []>} : vector<8x512xbf16>, vector<512x128xbf16>, vector<8x128xf32> -> vector<8x128xf32>
    %125 = tpu.concatenate %118, %124 in 1 : vector<8x128xf32>, vector<8x128xf32> -> vector<8x256xf32>
    %126 = vector.extract_strided_slice %0 {offsets = [24, 0], sizes = [8, 1], strides = [1, 1]} : vector<40x2xf32> to vector<8x1xf32>
    %127 = vector.extract_strided_slice %0 {offsets = [24, 1], sizes = [8, 1], strides = [1, 1]} : vector<40x2xf32> to vector<8x1xf32>
    %cst_42 = arith.constant dense<0.000000e+00> : vector<8xf32>
    %128 = vector.multi_reduction <add>, %125, %cst_42 [1] : vector<8x256xf32> to vector<8xf32>
    %129 = vector.shape_cast %128 : vector<8xf32> to vector<8x1xf32>
    %cst_43 = arith.constant 1.250000e-02 : f32
    %130 = vector.broadcast %cst_43 : f32 to vector<8x1xf32>
    %131 = arith.mulf %129, %130 : vector<8x1xf32>
    %132 = arith.mulf %125, %125 : vector<8x256xf32>
    %cst_44 = arith.constant dense<0.000000e+00> : vector<8xf32>
    %133 = vector.multi_reduction <add>, %132, %cst_44 [1] : vector<8x256xf32> to vector<8xf32>
    %134 = vector.shape_cast %133 : vector<8xf32> to vector<8x1xf32>
    %cst_45 = arith.constant 1.250000e-02 : f32
    %135 = vector.broadcast %cst_45 : f32 to vector<8x1xf32>
    %136 = arith.mulf %134, %135 : vector<8x1xf32>
    %137 = arith.mulf %131, %131 : vector<8x1xf32>
    %138 = arith.subf %136, %137 : vector<8x1xf32>
    %cst_46 = arith.constant 9.99999974E-6 : f32
    %139 = vector.broadcast %cst_46 : f32 to vector<8x1xf32>
    %140 = arith.addf %138, %139 : vector<8x1xf32>
    %141 = math.rsqrt %140 : vector<8x1xf32>
    %142 = arith.mulf %126, %141 : vector<8x1xf32>
    %143 = arith.mulf %131, %142 : vector<8x1xf32>
    %144 = arith.subf %127, %143 : vector<8x1xf32>
    %145 = vector.broadcast %142 : vector<8x1xf32> to vector<8x256xf32>
    %146 = arith.mulf %125, %145 : vector<8x256xf32>
    %147 = vector.broadcast %144 : vector<8x1xf32> to vector<8x256xf32>
    %148 = arith.addf %146, %147 : vector<8x256xf32>
    %cst_47 = arith.constant 0.000000e+00 : f32
    %149 = vector.broadcast %cst_47 : f32 to vector<8x256xf32>
    %150 = arith.maximumf %148, %149 : vector<8x256xf32>
    %151 = vector.extract_strided_slice %150 {offsets = [0, 0], sizes = [4, 128], strides = [1, 1]} : vector<8x256xf32> to vector<4x128xf32>
    %152 = vector.extract_strided_slice %150 {offsets = [4, 0], sizes = [4, 128], strides = [1, 1]} : vector<8x256xf32> to vector<4x128xf32>
    %153 = tpu.concatenate %151, %152 in 1 : vector<4x128xf32>, vector<4x128xf32> -> vector<4x256xf32>
    %154 = arith.truncf %153 : vector<4x256xf32> to vector<4x256xbf16>
    %cst_48 = arith.constant dense<0.000000e+00> : vector<4x256xf32>
    %155 = tpu.matmul %154, %7, %cst_48 {dimension_numbers = #tpu.dot_dimension_numbers<[1], [0], [0], [1], [0, 0, 1, 1], [], []>} : vector<4x256xbf16>, vector<256x256xbf16>, vector<4x256xf32> -> vector<4x256xf32>
    %156 = vector.extract_strided_slice %150 {offsets = [0, 128], sizes = [4, 128], strides = [1, 1]} : vector<8x256xf32> to vector<4x128xf32>
    %157 = vector.extract_strided_slice %150 {offsets = [4, 128], sizes = [4, 128], strides = [1, 1]} : vector<8x256xf32> to vector<4x128xf32>
    %158 = tpu.concatenate %156, %157 in 1 : vector<4x128xf32>, vector<4x128xf32> -> vector<4x256xf32>
    %159 = arith.truncf %158 : vector<4x256xf32> to vector<4x256xbf16>
    %cst_49 = arith.constant dense<0.000000e+00> : vector<4x256xf32>
    %160 = tpu.matmul %159, %7, %cst_49 {dimension_numbers = #tpu.dot_dimension_numbers<[1], [0], [0], [1], [0, 0, 1, 1], [], []>} : vector<4x256xbf16>, vector<256x256xbf16>, vector<4x256xf32> -> vector<4x256xf32>
    %161 = tpu.concatenate %155, %160 in 1 : vector<4x256xf32>, vector<4x256xf32> -> vector<4x512xf32>
    %162 = vector.extract_strided_slice %2 {offsets = [40, 0], sizes = [8, 4], strides = [1, 1]} : vector<48x8xf32> to vector<8x4xf32>
    %163 = arith.addf %62, %112 : vector<4x512xf32>
    %164 = arith.addf %163, %161 : vector<4x512xf32>
    %cst_50 = arith.constant dense<0.000000e+00> : vector<8x512xf32>
    %165 = tpu.matmul %162, %164, %cst_50 {dimension_numbers = #tpu.dot_dimension_numbers<[1], [0], [0], [1], [0, 0, 1, 1], [], []>} : vector<8x4xf32>, vector<4x512xf32>, vector<8x512xf32> -> vector<8x512xf32>
    %166 = arith.addf %63, %165 : vector<8x512xf32>
    %167 = vector.extract_strided_slice %0 {offsets = [32, 0], sizes = [8, 1], strides = [1, 1]} : vector<40x2xf32> to vector<8x1xf32>
    %168 = vector.extract_strided_slice %0 {offsets = [32, 1], sizes = [8, 1], strides = [1, 1]} : vector<40x2xf32> to vector<8x1xf32>
    %cst_51 = arith.constant dense<0.000000e+00> : vector<8xf32>
    %169 = vector.multi_reduction <add>, %166, %cst_51 [1] : vector<8x512xf32> to vector<8xf32>
    %170 = vector.shape_cast %169 : vector<8xf32> to vector<8x1xf32>
    %cst_52 = arith.constant 0.001953125 : f32
    %171 = vector.broadcast %cst_52 : f32 to vector<8x1xf32>
    %172 = arith.mulf %170, %171 : vector<8x1xf32>
    %173 = arith.mulf %166, %166 : vector<8x512xf32>
    %cst_53 = arith.constant dense<0.000000e+00> : vector<8xf32>
    %174 = vector.multi_reduction <add>, %173, %cst_53 [1] : vector<8x512xf32> to vector<8xf32>
    %175 = vector.shape_cast %174 : vector<8xf32> to vector<8x1xf32>
    %cst_54 = arith.constant 0.001953125 : f32
    %176 = vector.broadcast %cst_54 : f32 to vector<8x1xf32>
    %177 = arith.mulf %175, %176 : vector<8x1xf32>
    %178 = arith.mulf %172, %172 : vector<8x1xf32>
    %179 = arith.subf %177, %178 : vector<8x1xf32>
    %cst_55 = arith.constant 9.99999974E-6 : f32
    %180 = vector.broadcast %cst_55 : f32 to vector<8x1xf32>
    %181 = arith.addf %179, %180 : vector<8x1xf32>
    %182 = math.rsqrt %181 : vector<8x1xf32>
    %183 = arith.mulf %167, %182 : vector<8x1xf32>
    %184 = arith.mulf %172, %183 : vector<8x1xf32>
    %185 = arith.subf %168, %184 : vector<8x1xf32>
    %186 = vector.broadcast %183 : vector<8x1xf32> to vector<8x512xf32>
    %187 = arith.mulf %166, %186 : vector<8x512xf32>
    %188 = vector.broadcast %185 : vector<8x1xf32> to vector<8x512xf32>
    %189 = arith.addf %187, %188 : vector<8x512xf32>
    %cst_56 = arith.constant 0.000000e+00 : f32
    %190 = vector.broadcast %cst_56 : f32 to vector<8x512xf32>
    %191 = arith.maximumf %189, %190 : vector<8x512xf32>
    %c0_57 = arith.constant 0 : index
    %c0_58 = arith.constant 0 : index
    %192 = vector.load %arg10[%c0_57, %c0_58] : memref<8x512xf32, #tpu.memory_space<vmem>>, vector<8x512xf32>
    tpu.vector_store %arg10[%c0_57, %c0_58], %191 {strides = array<i32>} : memref<8x512xf32, #tpu.memory_space<vmem>>, vector<8x512xf32>,
    return
  }
  func.func @transform_0(%arg0: i32) -> (i32, i32) {
    %c0_i32 = arith.constant 0 : i32
    %c0_i32_0 = arith.constant 0 : i32
    %c0_i32_1 = arith.constant 0 : i32
    return %c0_i32, %c0_i32_0 : i32, i32
  }
  func.func @transform_1(%arg0: i32) -> (i32, i32) {
    %c0_i32 = arith.constant 0 : i32
    %c0_i32_0 = arith.constant 0 : i32
    %c0_i32_1 = arith.constant 0 : i32
    return %c0_i32, %c0_i32_0 : i32, i32
  }
  func.func @transform_2(%arg0: i32) -> (i32, i32) {
    %c0_i32 = arith.constant 0 : i32
    %c0_i32_0 = arith.constant 0 : i32
    %c0_i32_1 = arith.constant 0 : i32
    return %c0_i32, %c0_i32_0 : i32, i32
  }
  func.func @transform_3(%arg0: i32) -> (i32, i32) {
    %c0_i32 = arith.constant 0 : i32
    %c0_i32_0 = arith.constant 0 : i32
    %c0_i32_1 = arith.constant 0 : i32
    return %c0_i32, %c0_i32_0 : i32, i32
  }
  func.func @transform_4(%arg0: i32) -> (i32, i32) {
    %c0_i32 = arith.constant 0 : i32
    %c0_i32_0 = arith.constant 0 : i32
    %c0_i32_1 = arith.constant 0 : i32
    return %c0_i32, %c0_i32_0 : i32, i32
  }
  func.func @transform_5(%arg0: i32) -> (i32, i32) {
    %c0_i32 = arith.constant 0 : i32
    %c0_i32_0 = arith.constant 0 : i32
    %c0_i32_1 = arith.constant 0 : i32
    return %c0_i32, %c0_i32_0 : i32, i32
  }
  func.func @transform_6(%arg0: i32) -> (i32, i32) {
    %c0_i32 = arith.constant 0 : i32
    %c0_i32_0 = arith.constant 0 : i32
    %c0_i32_1 = arith.constant 0 : i32
    return %c0_i32, %c0_i32_0 : i32, i32
  }
  func.func @transform_7(%arg0: i32) -> (i32, i32) {
    %c0_i32 = arith.constant 0 : i32
    %c0_i32_0 = arith.constant 0 : i32
    %c0_i32_1 = arith.constant 0 : i32
    return %c0_i32, %c0_i32_0 : i32, i32
  }
  func.func @transform_8(%arg0: i32) -> (i32, i32) {
    %c0_i32 = arith.constant 0 : i32
    %c0_i32_0 = arith.constant 0 : i32
    %c0_i32_1 = arith.constant 0 : i32
    return %c0_i32, %c0_i32_0 : i32, i32
  }
  func.func @transform_9(%arg0: i32) -> (i32, i32) {
    %c0_i32 = arith.constant 0 : i32
    %c0_i32_0 = arith.constant 0 : i32
    %c0_i32_1 = arith.constant 0 : i32
    return %c0_i32, %c0_i32_0 : i32, i32
  }
}

</mosaic_0001>

<bundles_post_ra>
// kernel: ffc_bn_act_forward.1
= control target key start
LH: loop header
LB: loop body
LE: loop exit
PB: predicated region body
PF: predicated region fallthrough
CT: control target
= control target key end

     0   :  { %v3308_v2 = vmov 0.0   ;;  %vm275_vm0 = vcmask 64512   ;;  %vm504_vm1 = vcmask 1043456   ;;  %v3309_v43 = vmov 0   ;;  %s3311_s22 = smov 1   ;;  %s4297_s0 = inlined_call_operand.vmem [shape: f32[8,512], index: 0, kind: input, shape index: {}]   ;;  %s4298_s1 = inlined_call_operand.vmem [shape: f32[48,8], index: 1, kind: input, shape index: {}]   ;;  %s4299_s2 = inlined_call_operand.vmem [shape: f32[40,2], index: 2, kind: input, shape index: {}]   ;;  %s4300_s4 = inlined_call_operand.vmem [shape: bf16[512,256], index: 4, kind: input, shape index: {}]   ;;  %s4301_s5 = inlined_call_operand.vmem [shape: bf16[512,256], index: 5, kind: input, shape index: {}]   ;;  %s4302_s6 = inlined_call_operand.vmem [shape: bf16[512,128], index: 6, kind: input, shape index: {}]   ;;  %s4303_s3 = inlined_call_operand.vmem [shape: f32[8,512], index: 3, kind: input, shape index: {}]   ;;  %s4304_s7 = inlined_call_operand.vmem [shape: bf16[256,256], index: 7, kind: input, shape index: {}]   ;;  %s4305_s8 = inlined_call_operand.vmem [shape: f32[8,512], index: 8, kind: output, shape index: {0}]   ;;  %s4306_s9 = inlined_call_operand.vmem [shape: f32[8,512], index: 9, kind: output, shape index: {1}]  }
   0x1   :  { %v38_v0 = vld [vmem:[%s4297_s0 + $0x8] sm:$0xff]  ;;  %v37_v1 = vld [vmem:[%s4297_s0] sm:$0xff]  ;;  %349 = vmatprep.mubr.f32.mxu0 %v3308_v2  ;;  %432 = vmatprep.mubr.f32.mxu1 %v3308_v2  ;;  %v40_v4 = vld [vmem:[%s4297_s0 + $0x18] sm:$0xff]  ;;  %v3310_v51 = vmov 1   ;;  %vm562_vm2 = vcmask 31744  }
   0x2   :  { %v41_v3 = vld [vmem:[%s4298_s1] sm:$0xff]  ;;  %285 = vmatprep.subr.mxu0 %v38_v0  ;;  %v39_v5 = vld [vmem:[%s4297_s0 + $0x10] sm:$0xff]  ;;  %368 = vmatprep.subr.mxu1 %v40_v4  ;;  %v42_v6 = vld [vmem:[%s4298_s1 + $0x8] sm:$0xff] }
   0x3   :  { %286 = vmatpush1.msra.mxu0 %v37_v1  ;;  %369 = vmatpush1.msra.mxu1 %v39_v5  ;;  %v33_v52 = vld [vmem:[%s4299_s2 + $0x8] sm:$0xff]  ;;  %v43_v58 = vld [vmem:[%s4298_s1 + $0x10] sm:$0xff] }
   0x4   :  { %2683 = vmatmul.mubr.msk.f32.vlgmr.msra.gmra.mrb[0].mxu0 %vm275_vm0, %v41_v3  ;;  %2686 = vmatmul.mubr.msk.f32.vlgmr.msra.gmra.mrb[0].mxu1 %vm275_vm0, %v41_v3 }
   0x5   :  { %355 = vmatprep.mubr.f32.mxu0 %v3308_v2  ;;  %438 = vmatprep.mubr.f32.mxu1 %v3308_v2 }
   0x6   :  { %3019 = vset.pattern.permute.xlu1 %v3309_v43  ;;  %3020 = vset.pattern.permute.xlu0 %v3310_v51 }
   0x8   :  { %2684 = vmatmul.mubr.msk.f32.gmra.mrb[2].mxu0 %vm275_vm0, %v42_v6  ;;  %2687 = vmatmul.mubr.msk.f32.gmra.mrb[2].mxu1 %vm275_vm0, %v42_v6 }
   0x9   :  { %361 = vmatprep.mubr.f32.mxu0 %v3308_v2  ;;  %444 = vmatprep.mubr.f32.mxu1 %v3308_v2 }
   0xc   :  { %2685 = vmatmul.mubr.msk.f32.gmra.mrb[4].mxu0 %vm275_vm0, %v43_v58  ;;  %2688 = vmatmul.mubr.msk.f32.gmra.mrb[4].mxu1 %vm275_vm0, %v43_v58 }
   0xd   :  { %645 = vmatprep.mubr.f32.mxu0 %v3308_v2  ;;  %722 = vmatprep.mubr.f32.mxu1 %v3308_v2 }
  0xd7   :  { %v3390_v7 = vpop.f32.mrb[0].mxu0  ;;  %v3396_v10 = vpop.f32.mrb[0].mxu1 }
  0xd8   :  { %v457_v8 = vmul.f32 %v3390_v7, %v3390_v7  ;;  %v3394_v9 = vpop.f32.mrb[1].mxu0  ;;  %v3402_v13 = vpop.f32.mrb[1].mxu1  ;;  %v459_v14 = vmul.f32 %v3396_v10, %v3396_v10 }
  0xd9   :  { %v451_v11 = vadd.f32 %v3394_v9, %v3390_v7  ;;  %v458_v12 = vmul.f32 %v3394_v9, %v3394_v9  ;;  %v460_v30 = vmul.f32 %v3402_v13, %v3402_v13 }
  0xdb   :  { %v357_v15 = vpop.f32.mrb[2].mxu0  ;;  %v452_v16 = vadd.f32 %v451_v11, %v3396_v10  ;;  %v461_v17 = vadd.f32 %v458_v12, %v457_v8  ;;  %v440_v21 = vpop.f32.mrb[2].mxu1 }
  0xdc   :  { %v505_v18 = vsel %vm504_vm1, %v357_v15, 0.0  ;;  %v515_v19 = vmul.f32 %v357_v15, %v357_v15  ;;  %v359_v20 = vpop.f32.mrb[3].mxu0  ;;  %v517_v24 = vmul.f32 %v440_v21, %v440_v21  ;;  %v442_v25 = vpop.f32.mrb[3].mxu1  ;;  %v508_v26 = vsel %vm504_vm1, %v440_v21, 0.0 }
  0xdd   :  { %v506_v22 = vsel %vm504_vm1, %v359_v20, 0.0  ;;  %v516_v23 = vmul.f32 %v359_v20, %v359_v20  ;;  %v518_v28 = vmul.f32 %v442_v25, %v442_v25  ;;  %v3416_v33 = vadd.f32 %v452_v16, %v3402_v13  ;;  %v3026_v16 = vld [vmem:[%s4300_s4] ss:$8 sps:$4 sm:$0xff]  }
  0xde   :  { %v519_v27 = vsel %vm504_vm1, %v515_v19, 0.0  ;;  %v507_v29 = vadd.f32 %v506_v22, %v505_v18  ;;  %v522_v32 = vsel %vm504_vm1, %v517_v24, 0.0  ;;  %v462_v34 = vadd.f32 %v461_v17, %v459_v14  ;;  %v44_v14 = vld [vmem:[%s4298_s1 + $0x18] sm:$0xff]  ;;  %v45_v17 = vld [vmem:[%s4298_s1 + $0x20] sm:$0xff] }
  0xdf   :  { %v520_v31 = vsel %vm504_vm1, %v516_v23, 0.0  ;;  %v510_v37 = vsel %vm504_vm1, %v442_v25, 0.0  ;;  %v524_v41 = vsel %vm504_vm1, %v518_v28, 0.0  ;;  %v3031_v18 = vld [vmem:[%s4300_s4 + $0x14] ss:$8 sps:$4 sm:$0xff]  }
  0xe0   :  { %v509_v35 = vadd.f32 %v508_v26, %v507_v29  ;;  %v521_v36 = vadd.f32 %v520_v31, %v519_v27  ;;  %v3419_v38 = vadd.f32 %v462_v34, %v460_v30  ;;  %v3029_v19 = vld [vmem:[%s4300_s4 + $0x10] ss:$8 sps:$4 sm:$0xff]   ;;  %v3037_v22 = vld [vmem:[%s4300_s4 + $0x34] ss:$8 sps:$4 sm:$0xff]   ;;  %v3040_v24 = vld [vmem:[%s4300_s4 + $0x44] ss:$8 sps:$4 sm:$0xff]  }
  0xe1   :  { %v3035_v23 = vld [vmem:[%s4300_s4 + $0x30] ss:$8 sps:$4 sm:$0xff]   ;;  %v3043_v26 = vld [vmem:[%s4300_s4 + $0x54] ss:$8 sps:$4 sm:$0xff]   ;;  %v3046_v28 = vld [vmem:[%s4300_s4 + $0x64] ss:$8 sps:$4 sm:$0xff]  }
  0xe2   :  { %v511_v39 = vadd.f32 %v510_v37, %v509_v35  ;;  %v523_v40 = vadd.f32 %v522_v32, %v521_v36  ;;  %v3041_v27 = vld [vmem:[%s4300_s4 + $0x50] ss:$8 sps:$4 sm:$0xff]   ;;  %v3044_v29 = vld [vmem:[%s4300_s4 + $0x60] ss:$8 sps:$4 sm:$0xff]   ;;  %v3049_v30 = vld [vmem:[%s4300_s4 + $0x74] ss:$8 sps:$4 sm:$0xff]  }
  0xe3   :  { %v3047_v31 = vld [vmem:[%s4300_s4 + $0x70] ss:$8 sps:$4 sm:$0xff]   ;;  %v3052_v32 = vld [vmem:[%s4300_s4 + $0x84] ss:$8 sps:$4 sm:$0xff]   ;;  %v3050_v34 = vld [vmem:[%s4300_s4 + $0x80] ss:$8 sps:$4 sm:$0xff]  }
  0xe4   :  { %512 = vadd.xlane.f32.xlu0 %v511_v39  ;;  %v525_v42 = vadd.f32 %v524_v41, %v523_v40  ;;  %v3055_v35 = vld [vmem:[%s4300_s4 + $0x94] ss:$8 sps:$4 sm:$0xff]   ;;  %v3053_v36 = vld [vmem:[%s4300_s4 + $0x90] ss:$8 sps:$4 sm:$0xff]   ;;  %v3058_v37 = vld [vmem:[%s4300_s4 + $0xa4] ss:$8 sps:$4 sm:$0xff]  }
  0xe5   :  { %v3056_v39 = vld [vmem:[%s4300_s4 + $0xa0] ss:$8 sps:$4 sm:$0xff]   ;;  %v3061_v40 = vld [vmem:[%s4300_s4 + $0xb4] ss:$8 sps:$4 sm:$0xff]   ;;  %v3059_v41 = vld [vmem:[%s4300_s4 + $0xb0] ss:$8 sps:$4 sm:$0xff]  }
  0xe8   :  { %526 = vadd.xlane.f32.xlu0 %v525_v42  ;;  %v3064_v42 = vld [vmem:[%s4300_s4 + $0xc4] ss:$8 sps:$4 sm:$0xff]  }
 0x171   :  { %v513_v44 = vpop.xlane.xlu0 %512 }
 0x172   :  { %v514_v45 = vmul.f32 0.001953125, %v513_v44  ;;  %v3062_v44 = vld [vmem:[%s4300_s4 + $0xc0] ss:$8 sps:$4 sm:$0xff]  }
 0x174   :  { %v529_v47 = vmul.f32 %v514_v45, %v514_v45 }
 0x175   :  { %v527_v46 = vpop.xlane.xlu0 %526 }
 0x176   :  { %v528_v48 = vmul.f32 0.001953125, %v527_v46  ;;  %v3065_v46 = vld [vmem:[%s4300_s4 + $0xd0] ss:$8 sps:$4 sm:$0xff]  }
 0x178   :  { %v530_v49 = vsub.f32 %v528_v48, %v529_v47  ;;  %v3070_v47 = vld [vmem:[%s4300_s4 + $0xe4] ss:$8 sps:$4 sm:$0xff]   ;;  %v3068_v48 = vld [vmem:[%s4300_s4 + $0xe0] ss:$8 sps:$4 sm:$0xff]  }
 0x17a   :  { %v531_v50 = vadd.f32 1e-05, %v530_v49  ;;  %v3073_v49 = vld [vmem:[%s4300_s4 + $0xf4] ss:$8 sps:$4 sm:$0xff]  }
 0x17c   :  { %3298 = vrsqrt.f32 %v531_v50  ;;  %v3071_v50 = vld [vmem:[%s4300_s4 + $0xf0] ss:$8 sps:$4 sm:$0xff]  }
 0x186   :  { %v3299_v53 = vpop.eup %3298 }
 0x187   :  { %v533_v54 = vmul.f32 %v3299_v53, %v33_v52 }
 0x189   :  { %v534_v55 = vmul.f32 %v533_v54, %v514_v45  ;;  %v3067_v45 = vld [vmem:[%s4300_s4 + $0xd4] ss:$8 sps:$4 sm:$0xff]  }
 0x18b   :  { %536 = vrot.lane.b32.xlu1 %v534_v55, %s3311_s22 }
 0x18f   :  { %542 = vperm.xlu1 %3019, %v533_v54  }
 0x1fd   :  { %v537_v56 = vpop.permute.xlu1 %536 }
 0x1fe   :  { %v539_v57 = vsub.f32 %v33_v52, %v537_v56  ;;  %v3076_v52 = vld [vmem:[%s4300_s4 + $0x104] ss:$8 sps:$4 sm:$0xff]  }
 0x200   :  { %551 = vperm.xlu0 %3020, %v539_v57  }
 0x204   :  { %3021 = vset.pattern.permute.xlu0 %v3309_v43 }
 0x20e   :  { %v543_v59 = vpop.permute.xlu1 %542 }
 0x20f   :  { %v545_v60 = vmul.f32 %v543_v59, %v357_v15  ;;  %v546_v61 = vmul.f32 %v543_v59, %v359_v20  ;;  %v547_v62 = vmul.f32 %v543_v59, %v440_v21  ;;  %v548_v63 = vmul.f32 %v543_v59, %v442_v25  ;;  %v3028_v15 = vld [vmem:[%s4300_s4 + $0x4] ss:$8 sps:$4 sm:$0xff]   ;;  %v3032_v21 = vld [vmem:[%s4300_s4 + $0x20] ss:$8 sps:$4 sm:$0xff]  }
 0x210   :  { %v3034_v20 = vld [vmem:[%s4300_s4 + $0x24] ss:$8 sps:$4 sm:$0xff]   ;;  %v3038_v25 = vld [vmem:[%s4300_s4 + $0x40] ss:$8 sps:$4 sm:$0xff]  }
 0x27f   :  { %v552_v0 = vpop.permute.xlu0 %551 }
 0x280   :  { %v554_v1 = vadd.f32 %v552_v0, %v545_v60  ;;  %v555_v3 = vadd.f32 %v552_v0, %v546_v61  ;;  %v556_v4 = vadd.f32 %v552_v0, %v547_v62  ;;  %v557_v5 = vadd.f32 %v552_v0, %v548_v63  ;;  %v3074_v60 = vld [vmem:[%s4300_s4 + $0x100] ss:$8 sps:$4 sm:$0xff]   ;;  %v3079_v62 = vld [vmem:[%s4300_s4 + $0x114] ss:$8 sps:$4 sm:$0xff]  }
 0x282   :  { %v3436_v6 = vmax.f32 %v554_v1, 0.0  ;;  %v3438_v8 = vmax.f32 %v555_v3, 0.0  ;;  %v3440_v11 = vmax.f32 %v556_v4, 0.0  ;;  %v3442_v12 = vmax.f32 %v557_v5, 0.0  ;;  %v3077_v4 = vld [vmem:[%s4300_s4 + $0x110] ss:$8 sps:$4 sm:$0xff]  }
 0x284   :  { %2689 = vmatprep.subr.msk.mxu0 %vm504_vm1, %v3438_v8  ;;  %2693 = vmatprep.subr.msk.mxu1 %vm504_vm1, %v3442_v12 }
 0x285   :  { %2690 = vmatpush1.msk.msra.mxu0 %vm504_vm1, %v3436_v6  ;;  %2694 = vmatpush1.msk.msra.mxu1 %vm504_vm1, %v3440_v11 }
 0x286   :  { %2691 = vmatmul.mubr.msk.f32.vlgmr.msra.gmra.mrb[6].mxu0 %vm562_vm2, %v44_v14  ;;  %2695 = vmatmul.mubr.msk.f32.vlgmr.msra.gmra.mrb[6].mxu1 %vm562_vm2, %v44_v14 }
 0x287   :  { %651 = vmatprep.mubr.f32.mxu0 %v3308_v2  ;;  %728 = vmatprep.mubr.f32.mxu1 %v3308_v2 }
 0x288   :  { %1059 = vmatprep.subr.bf16.mxu0 %v3028_v15  ;;  %1145 = vmatprep.subr.bf16.mxu1 %v3028_v15  ;;  %v3082_v15 = vld [vmem:[%s4300_s4 + $0x124] ss:$8 sps:$4 sm:$0xff]  }
 0x289   :  { %1060 = vmatpush1.bf16.msra.mxu0 %v3026_v16  ;;  %1146 = vmatpush1.bf16.msra.mxu1 %v3026_v16  ;;  %v3080_v16 = vld [vmem:[%s4300_s4 + $0x120] ss:$8 sps:$4 sm:$0xff]  }
 0x28a   :  { %2692 = vmatmul.mubr.msk.f32.gmra.mrb[8].mxu0 %vm562_vm2, %v45_v17  ;;  %2696 = vmatmul.mubr.msk.f32.gmra.mrb[8].mxu1 %vm562_vm2, %v45_v17  ;;  %v3085_v17 = vld [vmem:[%s4300_s4 + $0x134] ss:$8 sps:$4 sm:$0xff]  }
 0x28b   :  { %1061 = vmatprep.subr.bf16.mxu0 %v3031_v18  ;;  %1147 = vmatprep.subr.bf16.mxu1 %v3031_v18  ;;  %v3083_v18 = vld [vmem:[%s4300_s4 + $0x130] ss:$8 sps:$4 sm:$0xff]  }
 0x28d   :  { %1062 = vmatpush1.bf16.msra.mxu0 %v3029_v19  ;;  %1148 = vmatpush1.bf16.msra.mxu1 %v3029_v19  ;;  %v3088_v19 = vld [vmem:[%s4300_s4 + $0x144] ss:$8 sps:$4 sm:$0xff]  }
 0x28e   :  { %1063 = vmatprep.subr.bf16.mxu0 %v3034_v20  ;;  %1149 = vmatprep.subr.bf16.mxu1 %v3034_v20  ;;  %v3086_v20 = vld [vmem:[%s4300_s4 + $0x140] ss:$8 sps:$4 sm:$0xff]  }
 0x291   :  { %1064 = vmatpush1.bf16.msra.mxu0 %v3032_v21  ;;  %1150 = vmatpush1.bf16.msra.mxu1 %v3032_v21  ;;  %v3091_v21 = vld [vmem:[%s4300_s4 + $0x154] ss:$8 sps:$4 sm:$0xff]  }
 0x292   :  { %1065 = vmatprep.subr.bf16.mxu0 %v3037_v22  ;;  %1151 = vmatprep.subr.bf16.mxu1 %v3037_v22  ;;  %v3089_v22 = vld [vmem:[%s4300_s4 + $0x150] ss:$8 sps:$4 sm:$0xff]  }
 0x295   :  { %1066 = vmatpush1.bf16.msra.mxu0 %v3035_v23  ;;  %1152 = vmatpush1.bf16.msra.mxu1 %v3035_v23  ;;  %v3094_v23 = vld [vmem:[%s4300_s4 + $0x164] ss:$8 sps:$4 sm:$0xff]  }
 0x296   :  { %1067 = vmatprep.subr.bf16.mxu0 %v3040_v24  ;;  %1153 = vmatprep.subr.bf16.mxu1 %v3040_v24  ;;  %v3092_v24 = vld [vmem:[%s4300_s4 + $0x160] ss:$8 sps:$4 sm:$0xff]  }
 0x299   :  { %1068 = vmatpush1.bf16.msra.mxu0 %v3038_v25  ;;  %1154 = vmatpush1.bf16.msra.mxu1 %v3038_v25  ;;  %v3097_v25 = vld [vmem:[%s4300_s4 + $0x174] ss:$8 sps:$4 sm:$0xff]  }
 0x29a   :  { %1069 = vmatprep.subr.bf16.mxu0 %v3043_v26  ;;  %1155 = vmatprep.subr.bf16.mxu1 %v3043_v26  ;;  %v3095_v26 = vld [vmem:[%s4300_s4 + $0x170] ss:$8 sps:$4 sm:$0xff]  }
 0x29d   :  { %1070 = vmatpush1.bf16.msra.mxu0 %v3041_v27  ;;  %1156 = vmatpush1.bf16.msra.mxu1 %v3041_v27  ;;  %v3100_v27 = vld [vmem:[%s4300_s4 + $0x184] ss:$8 sps:$4 sm:$0xff]  }
 0x29e   :  { %1071 = vmatprep.subr.bf16.mxu0 %v3046_v28  ;;  %1157 = vmatprep.subr.bf16.mxu1 %v3046_v28  ;;  %v3098_v28 = vld [vmem:[%s4300_s4 + $0x180] ss:$8 sps:$4 sm:$0xff]  }
 0x2a1   :  { %1072 = vmatpush1.bf16.msra.mxu0 %v3044_v29  ;;  %1158 = vmatpush1.bf16.msra.mxu1 %v3044_v29  ;;  %v3103_v29 = vld [vmem:[%s4300_s4 + $0x194] ss:$8 sps:$4 sm:$0xff]  }
 0x2a2   :  { %1073 = vmatprep.subr.bf16.mxu0 %v3049_v30  ;;  %1159 = vmatprep.subr.bf16.mxu1 %v3049_v30  ;;  %v3101_v30 = vld [vmem:[%s4300_s4 + $0x190] ss:$8 sps:$4 sm:$0xff]  }
 0x2a5   :  { %1074 = vmatpush1.bf16.msra.mxu0 %v3047_v31  ;;  %1160 = vmatpush1.bf16.msra.mxu1 %v3047_v31  ;;  %v3106_v31 = vld [vmem:[%s4300_s4 + $0x1a4] ss:$8 sps:$4 sm:$0xff]  }
 0x2a6   :  { %1075 = vmatprep.subr.bf16.mxu0 %v3052_v32  ;;  %1161 = vmatprep.subr.bf16.mxu1 %v3052_v32  ;;  %v3104_v32 = vld [vmem:[%s4300_s4 + $0x1a0] ss:$8 sps:$4 sm:$0xff]  }
 0x2a9   :  { %1076 = vmatpush1.bf16.msra.mxu0 %v3050_v34  ;;  %1162 = vmatpush1.bf16.msra.mxu1 %v3050_v34  ;;  %v3109_v34 = vld [vmem:[%s4300_s4 + $0x1b4] ss:$8 sps:$4 sm:$0xff]  }
 0x2aa   :  { %1077 = vmatprep.subr.bf16.mxu0 %v3055_v35  ;;  %1163 = vmatprep.subr.bf16.mxu1 %v3055_v35  ;;  %v3107_v35 = vld [vmem:[%s4300_s4 + $0x1b0] ss:$8 sps:$4 sm:$0xff]  }
 0x2ad   :  { %1078 = vmatpush1.bf16.msra.mxu0 %v3053_v36  ;;  %1164 = vmatpush1.bf16.msra.mxu1 %v3053_v36  ;;  %v3112_v36 = vld [vmem:[%s4300_s4 + $0x1c4] ss:$8 sps:$4 sm:$0xff]  }
 0x2ae   :  { %1079 = vmatprep.subr.bf16.mxu0 %v3058_v37  ;;  %1165 = vmatprep.subr.bf16.mxu1 %v3058_v37  ;;  %v3110_v37 = vld [vmem:[%s4300_s4 + $0x1c0] ss:$8 sps:$4 sm:$0xff]  }
 0x2b1   :  { %1080 = vmatpush1.bf16.msra.mxu0 %v3056_v39  ;;  %1166 = vmatpush1.bf16.msra.mxu1 %v3056_v39  ;;  %v3115_v39 = vld [vmem:[%s4300_s4 + $0x1d4] ss:$8 sps:$4 sm:$0xff]  }
 0x2b2   :  { %1081 = vmatprep.subr.bf16.mxu0 %v3061_v40  ;;  %1167 = vmatprep.subr.bf16.mxu1 %v3061_v40  ;;  %v3113_v40 = vld [vmem:[%s4300_s4 + $0x1d0] ss:$8 sps:$4 sm:$0xff]  }
 0x2b5   :  { %1082 = vmatpush1.bf16.msra.mxu0 %v3059_v41  ;;  %1168 = vmatpush1.bf16.msra.mxu1 %v3059_v41  ;;  %v3118_v41 = vld [vmem:[%s4300_s4 + $0x1e4] ss:$8 sps:$4 sm:$0xff]  }
 0x2b6   :  { %1083 = vmatprep.subr.bf16.mxu0 %v3064_v42  ;;  %1169 = vmatprep.subr.bf16.mxu1 %v3064_v42  ;;  %v3116_v42 = vld [vmem:[%s4300_s4 + $0x1e0] ss:$8 sps:$4 sm:$0xff]  }
 0x2b9   :  { %1084 = vmatpush1.bf16.msra.mxu0 %v3062_v44  ;;  %1170 = vmatpush1.bf16.msra.mxu1 %v3062_v44  ;;  %v3121_v44 = vld [vmem:[%s4300_s4 + $0x1f4] ss:$8 sps:$4 sm:$0xff]  }
 0x2ba   :  { %1085 = vmatprep.subr.bf16.mxu0 %v3067_v45  ;;  %1171 = vmatprep.subr.bf16.mxu1 %v3067_v45  ;;  %v3119_v45 = vld [vmem:[%s4300_s4 + $0x1f0] ss:$8 sps:$4 sm:$0xff]  }
 0x2bd   :  { %1086 = vmatpush1.bf16.msra.mxu0 %v3065_v46  ;;  %1172 = vmatpush1.bf16.msra.mxu1 %v3065_v46 }
 0x2be   :  { %1087 = vmatprep.subr.bf16.mxu0 %v3070_v47  ;;  %1173 = vmatprep.subr.bf16.mxu1 %v3070_v47 }
 0x2c1   :  { %1088 = vmatpush1.bf16.msra.mxu0 %v3068_v48  ;;  %1174 = vmatpush1.bf16.msra.mxu1 %v3068_v48 }
 0x2c2   :  { %1089 = vmatprep.subr.bf16.mxu0 %v3073_v49  ;;  %1175 = vmatprep.subr.bf16.mxu1 %v3073_v49 }
 0x2c5   :  { %1090 = vmatpush1.bf16.msra.mxu0 %v3071_v50  ;;  %1176 = vmatpush1.bf16.msra.mxu1 %v3071_v50 }
 0x2c6   :  { %1100 = vmatprep.subr.bf16.mxu0 %v3076_v52  ;;  %1186 = vmatprep.subr.bf16.mxu1 %v3076_v52 }
 0x359   :  { %v647_v53 = vpop.f32.mrb[6].mxu0  ;;  %v724_v54 = vpop.f32.mrb[6].mxu1 }
 0x35a   :  { %v1141_v55 = vpack.c.bf16 %v724_v54, %v724_v54  ;;  %v649_v56 = vpop.f32.mrb[7].mxu0  ;;  %v726_v57 = vpop.f32.mrb[7].mxu1  ;;  %v735_v61 = vpack.c.bf16 %v647_v53, %v647_v53 }
 0x35b   :  { %v736_v58 = vpack.c.bf16 %v649_v56, %v649_v56  ;;  %v1142_v59 = vpack.c.bf16 %v726_v57, %v726_v57 }
 0x35d   :  { %1091 = vmatprep.mubr.bf16.mxu0 %v736_v58  ;;  %1177 = vmatprep.mubr.bf16.mxu1 %v1142_v59  ;;  %v3569_v63 = vpop.f32.mrb[8].mxu0  ;;  %v3571_v0 = vpop.f32.mrb[8].mxu1 }
 0x35e   :  { %1092 = vmatmul.mubr.bf16.vlgmr.msra.gmra.mrb[12].mxu0 %v735_v61  ;;  %1178 = vmatmul.mubr.bf16.vlgmr.msra.gmra.mrb[12].mxu1 %v1141_v55  ;;  %v655_v1 = vpop.f32.mrb[9].mxu0  ;;  %v732_v3 = vpop.f32.mrb[9].mxu1  ;;  %v1143_v46 = vpack.c.bf16 %v3571_v0, %v3571_v0  ;;  %v737_v47 = vpack.c.bf16 %v3569_v63, %v3569_v63 }
 0x35f   :  { %1101 = vmatpush1.bf16.msra.mxu0 %v3074_v60  ;;  %1187 = vmatpush1.bf16.msra.mxu1 %v3074_v60  ;;  %v738_v5 = vpack.c.bf16 %v655_v1, %v655_v1  ;;  %v1144_v14 = vpack.c.bf16 %v732_v3, %v732_v3 }
 0x360   :  { %1102 = vmatprep.subr.bf16.mxu0 %v3079_v62  ;;  %1188 = vmatprep.subr.bf16.mxu1 %v3079_v62 }
 0x361   :  { %1132 = vmatprep.mubr.bf16.mxu0 %v738_v5  ;;  %1218 = vmatprep.mubr.bf16.mxu1 %v1144_v14 }
 0x363   :  { %1103 = vmatpush1.bf16.msra.mxu0 %v3077_v4  ;;  %1189 = vmatpush1.bf16.msra.mxu1 %v3077_v4 }
 0x364   :  { %1104 = vmatprep.subr.bf16.mxu0 %v3082_v15  ;;  %1190 = vmatprep.subr.bf16.mxu1 %v3082_v15 }
 0x367   :  { %1105 = vmatpush1.bf16.msra.mxu0 %v3080_v16  ;;  %1191 = vmatpush1.bf16.msra.mxu1 %v3080_v16 }
 0x368   :  { %1106 = vmatprep.subr.bf16.mxu0 %v3085_v17  ;;  %1192 = vmatprep.subr.bf16.mxu1 %v3085_v17 }
 0x36b   :  { %1107 = vmatpush1.bf16.msra.mxu0 %v3083_v18  ;;  %1193 = vmatpush1.bf16.msra.mxu1 %v3083_v18 }
 0x36c   :  { %1108 = vmatprep.subr.bf16.mxu0 %v3088_v19  ;;  %1194 = vmatprep.subr.bf16.mxu1 %v3088_v19  ;;  %v3687_v19 = vld [vmem:[%s4299_s2 + $0x10] sm:$0xff] }
 0x36f   :  { %1109 = vmatpush1.bf16.msra.mxu0 %v3086_v20  ;;  %1195 = vmatpush1.bf16.msra.mxu1 %v3086_v20 }
 0x370   :  { %1110 = vmatprep.subr.bf16.mxu0 %v3091_v21  ;;  %1196 = vmatprep.subr.bf16.mxu1 %v3091_v21 }
 0x373   :  { %1111 = vmatpush1.bf16.msra.mxu0 %v3089_v22  ;;  %1197 = vmatpush1.bf16.msra.mxu1 %v3089_v22 }
 0x374   :  { %1112 = vmatprep.subr.bf16.mxu0 %v3094_v23  ;;  %1198 = vmatprep.subr.bf16.mxu1 %v3094_v23  ;;  %v3122_v23 = vld [vmem:[%s4301_s5] ss:$8 sps:$4 sm:$0xff]  }
 0x377   :  { %1113 = vmatpush1.bf16.msra.mxu0 %v3092_v24  ;;  %1199 = vmatpush1.bf16.msra.mxu1 %v3092_v24  ;;  %v3124_v24 = vld [vmem:[%s4301_s5 + $0x4] ss:$8 sps:$4 sm:$0xff]  }
 0x378   :  { %1114 = vmatprep.subr.bf16.mxu0 %v3097_v25  ;;  %1200 = vmatprep.subr.bf16.mxu1 %v3097_v25  ;;  %v3127_v25 = vld [vmem:[%s4301_s5 + $0x14] ss:$8 sps:$4 sm:$0xff]  }
 0x37b   :  { %1115 = vmatpush1.bf16.msra.mxu0 %v3095_v26  ;;  %1201 = vmatpush1.bf16.msra.mxu1 %v3095_v26  ;;  %v3125_v26 = vld [vmem:[%s4301_s5 + $0x10] ss:$8 sps:$4 sm:$0xff]  }
 0x37c   :  { %1116 = vmatprep.subr.bf16.mxu0 %v3100_v27  ;;  %1202 = vmatprep.subr.bf16.mxu1 %v3100_v27  ;;  %v3130_v27 = vld [vmem:[%s4301_s5 + $0x24] ss:$8 sps:$4 sm:$0xff]  }
 0x37f   :  { %1117 = vmatpush1.bf16.msra.mxu0 %v3098_v28  ;;  %1203 = vmatpush1.bf16.msra.mxu1 %v3098_v28  ;;  %v3128_v28 = vld [vmem:[%s4301_s5 + $0x20] ss:$8 sps:$4 sm:$0xff]  }
 0x380   :  { %1118 = vmatprep.subr.bf16.mxu0 %v3103_v29  ;;  %1204 = vmatprep.subr.bf16.mxu1 %v3103_v29  ;;  %v3133_v29 = vld [vmem:[%s4301_s5 + $0x34] ss:$8 sps:$4 sm:$0xff]  }
 0x383   :  { %1119 = vmatpush1.bf16.msra.mxu0 %v3101_v30  ;;  %1205 = vmatpush1.bf16.msra.mxu1 %v3101_v30  ;;  %v3131_v30 = vld [vmem:[%s4301_s5 + $0x30] ss:$8 sps:$4 sm:$0xff]  }
 0x384   :  { %1120 = vmatprep.subr.bf16.mxu0 %v3106_v31  ;;  %1206 = vmatprep.subr.bf16.mxu1 %v3106_v31  ;;  %v3136_v31 = vld [vmem:[%s4301_s5 + $0x44] ss:$8 sps:$4 sm:$0xff]  }
 0x387   :  { %1121 = vmatpush1.bf16.msra.mxu0 %v3104_v32  ;;  %1207 = vmatpush1.bf16.msra.mxu1 %v3104_v32  ;;  %v3134_v32 = vld [vmem:[%s4301_s5 + $0x40] ss:$8 sps:$4 sm:$0xff]  }
 0x388   :  { %1122 = vmatprep.subr.bf16.mxu0 %v3109_v34  ;;  %1208 = vmatprep.subr.bf16.mxu1 %v3109_v34  ;;  %v3139_v34 = vld [vmem:[%s4301_s5 + $0x54] ss:$8 sps:$4 sm:$0xff]  }
 0x38b   :  { %1123 = vmatpush1.bf16.msra.mxu0 %v3107_v35  ;;  %1209 = vmatpush1.bf16.msra.mxu1 %v3107_v35  ;;  %v3137_v35 = vld [vmem:[%s4301_s5 + $0x50] ss:$8 sps:$4 sm:$0xff]  }
 0x38c   :  { %1124 = vmatprep.subr.bf16.mxu0 %v3112_v36  ;;  %1210 = vmatprep.subr.bf16.mxu1 %v3112_v36  ;;  %v3142_v36 = vld [vmem:[%s4301_s5 + $0x64] ss:$8 sps:$4 sm:$0xff]  }
 0x38f   :  { %1125 = vmatpush1.bf16.msra.mxu0 %v3110_v37  ;;  %1211 = vmatpush1.bf16.msra.mxu1 %v3110_v37  ;;  %v3140_v37 = vld [vmem:[%s4301_s5 + $0x60] ss:$8 sps:$4 sm:$0xff]  }
 0x390   :  { %1126 = vmatprep.subr.bf16.mxu0 %v3115_v39  ;;  %1212 = vmatprep.subr.bf16.mxu1 %v3115_v39  ;;  %v3145_v39 = vld [vmem:[%s4301_s5 + $0x74] ss:$8 sps:$4 sm:$0xff]  }
 0x393   :  { %1127 = vmatpush1.bf16.msra.mxu0 %v3113_v40  ;;  %1213 = vmatpush1.bf16.msra.mxu1 %v3113_v40  ;;  %v3143_v40 = vld [vmem:[%s4301_s5 + $0x70] ss:$8 sps:$4 sm:$0xff]  }
 0x394   :  { %1128 = vmatprep.subr.bf16.mxu0 %v3118_v41  ;;  %1214 = vmatprep.subr.bf16.mxu1 %v3118_v41  ;;  %v3148_v41 = vld [vmem:[%s4301_s5 + $0x84] ss:$8 sps:$4 sm:$0xff]  }
 0x397   :  { %1129 = vmatpush1.bf16.msra.mxu0 %v3116_v42  ;;  %1215 = vmatpush1.bf16.msra.mxu1 %v3116_v42  ;;  %v3146_v42 = vld [vmem:[%s4301_s5 + $0x80] ss:$8 sps:$4 sm:$0xff]  }
 0x398   :  { %1130 = vmatprep.subr.bf16.mxu0 %v3121_v44  ;;  %1216 = vmatprep.subr.bf16.mxu1 %v3121_v44  ;;  %v3151_v44 = vld [vmem:[%s4301_s5 + $0x94] ss:$8 sps:$4 sm:$0xff]  }
 0x39b   :  { %1131 = vmatpush1.bf16.msra.mxu0 %v3119_v45  ;;  %1217 = vmatpush1.bf16.msra.mxu1 %v3119_v45  ;;  %v3149_v45 = vld [vmem:[%s4301_s5 + $0x90] ss:$8 sps:$4 sm:$0xff]  }
 0x39c   :  { %1606 = vmatprep.subr.bf16.mxu0 %v3124_v24  ;;  %1698 = vmatprep.subr.bf16.mxu1 %v3124_v24 }
 0x39e   :  { %1133 = vmatmul.mubr.bf16.vlgmr.msra.gmra.mrb[12].mxu0 %v737_v47  ;;  %1219 = vmatmul.mubr.bf16.vlgmr.msra.gmra.mrb[12].mxu1 %v1143_v46  ;;  %v3154_v46 = vld [vmem:[%s4301_s5 + $0xa4] ss:$8 sps:$4 sm:$0xff]   ;;  %v3152_v47 = vld [vmem:[%s4301_s5 + $0xa0] ss:$8 sps:$4 sm:$0xff]  }
 0x39f   :  { %1607 = vmatpush1.bf16.msra.mxu0 %v3122_v23  ;;  %1699 = vmatpush1.bf16.msra.mxu1 %v3122_v23 }
 0x3a0   :  { %1608 = vmatprep.subr.bf16.mxu0 %v3127_v25  ;;  %1700 = vmatprep.subr.bf16.mxu1 %v3127_v25 }
 0x3a3   :  { %1609 = vmatpush1.bf16.msra.mxu0 %v3125_v26  ;;  %1701 = vmatpush1.bf16.msra.mxu1 %v3125_v26 }
 0x3a4   :  { %1610 = vmatprep.subr.bf16.mxu0 %v3130_v27  ;;  %1702 = vmatprep.subr.bf16.mxu1 %v3130_v27 }
 0x3a7   :  { %1611 = vmatpush1.bf16.msra.mxu0 %v3128_v28  ;;  %1703 = vmatpush1.bf16.msra.mxu1 %v3128_v28  ;;  %v3175_v28 = vld [vmem:[%s4301_s5 + $0x114] ss:$8 sps:$4 sm:$0xff]  }
 0x3a8   :  { %1612 = vmatprep.subr.bf16.mxu0 %v3133_v29  ;;  %1704 = vmatprep.subr.bf16.mxu1 %v3133_v29 }
 0x3ab   :  { %1613 = vmatpush1.bf16.msra.mxu0 %v3131_v30  ;;  %1705 = vmatpush1.bf16.msra.mxu1 %v3131_v30 }
 0x3ac   :  { %1614 = vmatprep.subr.bf16.mxu0 %v3136_v31  ;;  %1706 = vmatprep.subr.bf16.mxu1 %v3136_v31  ;;  %v3173_v31 = vld [vmem:[%s4301_s5 + $0x110] ss:$8 sps:$4 sm:$0xff]  }
 0x3af   :  { %1615 = vmatpush1.bf16.msra.mxu0 %v3134_v32  ;;  %1707 = vmatpush1.bf16.msra.mxu1 %v3134_v32  ;;  %v3178_v32 = vld [vmem:[%s4301_s5 + $0x124] ss:$8 sps:$4 sm:$0xff]  }
 0x3b0   :  { %1616 = vmatprep.subr.bf16.mxu0 %v3139_v34  ;;  %1708 = vmatprep.subr.bf16.mxu1 %v3139_v34  ;;  %v3176_v34 = vld [vmem:[%s4301_s5 + $0x120] ss:$8 sps:$4 sm:$0xff]  }
 0x3b3   :  { %1617 = vmatpush1.bf16.msra.mxu0 %v3137_v35  ;;  %1709 = vmatpush1.bf16.msra.mxu1 %v3137_v35  ;;  %v3181_v35 = vld [vmem:[%s4301_s5 + $0x134] ss:$8 sps:$4 sm:$0xff]  }
 0x3b4   :  { %1618 = vmatprep.subr.bf16.mxu0 %v3142_v36  ;;  %1710 = vmatprep.subr.bf16.mxu1 %v3142_v36  ;;  %v3179_v36 = vld [vmem:[%s4301_s5 + $0x130] ss:$8 sps:$4 sm:$0xff]  }
 0x3b7   :  { %1619 = vmatpush1.bf16.msra.mxu0 %v3140_v37  ;;  %1711 = vmatpush1.bf16.msra.mxu1 %v3140_v37  ;;  %v3184_v37 = vld [vmem:[%s4301_s5 + $0x144] ss:$8 sps:$4 sm:$0xff]  }
 0x3b8   :  { %1620 = vmatprep.subr.bf16.mxu0 %v3145_v39  ;;  %1712 = vmatprep.subr.bf16.mxu1 %v3145_v39  ;;  %v3182_v39 = vld [vmem:[%s4301_s5 + $0x140] ss:$8 sps:$4 sm:$0xff]  }
 0x3bb   :  { %1621 = vmatpush1.bf16.msra.mxu0 %v3143_v40  ;;  %1713 = vmatpush1.bf16.msra.mxu1 %v3143_v40  ;;  %v3187_v40 = vld [vmem:[%s4301_s5 + $0x154] ss:$8 sps:$4 sm:$0xff]  }
 0x3bc   :  { %1622 = vmatprep.subr.bf16.mxu0 %v3148_v41  ;;  %1714 = vmatprep.subr.bf16.mxu1 %v3148_v41  ;;  %v3185_v41 = vld [vmem:[%s4301_s5 + $0x150] ss:$8 sps:$4 sm:$0xff]  }
 0x3bf   :  { %1623 = vmatpush1.bf16.msra.mxu0 %v3146_v42  ;;  %1715 = vmatpush1.bf16.msra.mxu1 %v3146_v42  ;;  %v3190_v42 = vld [vmem:[%s4301_s5 + $0x164] ss:$8 sps:$4 sm:$0xff]  }
 0x3c0   :  { %1624 = vmatprep.subr.bf16.mxu0 %v3151_v44  ;;  %1716 = vmatprep.subr.bf16.mxu1 %v3151_v44  ;;  %v3188_v44 = vld [vmem:[%s4301_s5 + $0x160] ss:$8 sps:$4 sm:$0xff]  }
 0x3c3   :  { %1625 = vmatpush1.bf16.msra.mxu0 %v3149_v45  ;;  %1717 = vmatpush1.bf16.msra.mxu1 %v3149_v45  ;;  %v3193_v45 = vld [vmem:[%s4301_s5 + $0x174] ss:$8 sps:$4 sm:$0xff]  }
 0x3c4   :  { %1626 = vmatprep.subr.bf16.mxu0 %v3154_v46  ;;  %1718 = vmatprep.subr.bf16.mxu1 %v3154_v46  ;;  %v3191_v46 = vld [vmem:[%s4301_s5 + $0x170] ss:$8 sps:$4 sm:$0xff]  }
 0x3c7   :  { %1627 = vmatpush1.bf16.msra.mxu0 %v3152_v47  ;;  %1719 = vmatpush1.bf16.msra.mxu1 %v3152_v47  ;;  %v3196_v47 = vld [vmem:[%s4301_s5 + $0x184] ss:$8 sps:$4 sm:$0xff]  }
 0x471   :  { %v3664_v48 = vpop.f32.mrb[12].mxu0  ;;  %v3666_v49 = vpop.f32.mrb[12].mxu1 }
 0x472   :  { %v1233_v50 = vmul.f32 %v3664_v48, %v3664_v48  ;;  %v3670_v52 = vpop.f32.mrb[13].mxu0  ;;  %v3672_v53 = vpop.f32.mrb[13].mxu1  ;;  %v1235_v60 = vmul.f32 %v3666_v49, %v3666_v49 }
 0x473   :  { %v1227_v54 = vadd.f32 %v3670_v52, %v3664_v48  ;;  %v1234_v55 = vmul.f32 %v3670_v52, %v3670_v52  ;;  %v1138_v56 = vpop.f32.mrb[14].mxu0  ;;  %v1224_v57 = vpop.f32.mrb[14].mxu1  ;;  %v1236_v0 = vmul.f32 %v3672_v53, %v3672_v53 }
 0x474   :  { %v1139_v58 = vpop.f32.mrb[15].mxu0  ;;  %v1225_v59 = vpop.f32.mrb[15].mxu1  ;;  %v3158_v56 = vld [vmem:[%s4301_s5 + $0xc0] ss:$8 sps:$4 sm:$0xff]   ;;  %v3163_v57 = vld [vmem:[%s4301_s5 + $0xd4] ss:$8 sps:$4 sm:$0xff]  }
 0x475   :  { %v1228_v61 = vadd.f32 %v1227_v54, %v3666_v49  ;;  %v1237_v62 = vadd.f32 %v1234_v55, %v1233_v50  ;;  %v3157_v50 = vld [vmem:[%s4301_s5 + $0xb4] ss:$8 sps:$4 sm:$0xff]   ;;  %v3155_v54 = vld [vmem:[%s4301_s5 + $0xb0] ss:$8 sps:$4 sm:$0xff]   ;;  %v3160_v55 = vld [vmem:[%s4301_s5 + $0xc4] ss:$8 sps:$4 sm:$0xff]  }
 0x476   :  { %1628 = vmatprep.subr.bf16.mxu0 %v3157_v50  ;;  %1720 = vmatprep.subr.bf16.mxu1 %v3157_v50  ;;  %v3161_v58 = vld [vmem:[%s4301_s5 + $0xd0] ss:$8 sps:$4 sm:$0xff]   ;;  %v3166_v59 = vld [vmem:[%s4301_s5 + $0xe4] ss:$8 sps:$4 sm:$0xff]   ;;  %v3194_v50 = vld [vmem:[%s4301_s5 + $0x180] ss:$8 sps:$4 sm:$0xff]  }
 0x477   :  { %v1229_v63 = vadd.f32 %v1228_v61, %v3672_v53  ;;  %v1238_v1 = vadd.f32 %v1237_v62, %v1235_v60  ;;  %1629 = vmatpush1.bf16.msra.mxu0 %v3155_v54  ;;  %1721 = vmatpush1.bf16.msra.mxu1 %v3155_v54  ;;  %v3164_v60 = vld [vmem:[%s4301_s5 + $0xe0] ss:$8 sps:$4 sm:$0xff]   ;;  %v3199_v54 = vld [vmem:[%s4301_s5 + $0x194] ss:$8 sps:$4 sm:$0xff]  }
 0x478   :  { %1630 = vmatprep.subr.bf16.mxu0 %v3160_v55  ;;  %1722 = vmatprep.subr.bf16.mxu1 %v3160_v55  ;;  %v3197_v55 = vld [vmem:[%s4301_s5 + $0x190] ss:$8 sps:$4 sm:$0xff]  }
 0x479   :  { %1230 = vadd.xlane.f32.xlu1 %v1229_v63  ;;  %v1239_v3 = vadd.f32 %v1238_v1, %v1236_v0  ;;  %v3169_v63 = vld [vmem:[%s4301_s5 + $0xf4] ss:$8 sps:$4 sm:$0xff]   ;;  %v3167_v0 = vld [vmem:[%s4301_s5 + $0xf0] ss:$8 sps:$4 sm:$0xff]   ;;  %v3172_v1 = vld [vmem:[%s4301_s5 + $0x104] ss:$8 sps:$4 sm:$0xff]  }
 0x47b   :  { %1631 = vmatpush1.bf16.msra.mxu0 %v3158_v56  ;;  %1723 = vmatpush1.bf16.msra.mxu1 %v3158_v56  ;;  %v3202_v56 = vld [vmem:[%s4301_s5 + $0x1a4] ss:$8 sps:$4 sm:$0xff]  }
 0x47c   :  { %1632 = vmatprep.subr.bf16.mxu0 %v3163_v57  ;;  %1724 = vmatprep.subr.bf16.mxu1 %v3163_v57  ;;  %v3200_v57 = vld [vmem:[%s4301_s5 + $0x1a0] ss:$8 sps:$4 sm:$0xff]  }
 0x47d   :  { %1240 = vadd.xlane.f32.xlu1 %v1239_v3 }
 0x47f   :  { %1633 = vmatpush1.bf16.msra.mxu0 %v3161_v58  ;;  %1725 = vmatpush1.bf16.msra.mxu1 %v3161_v58  ;;  %v3205_v58 = vld [vmem:[%s4301_s5 + $0x1b4] ss:$8 sps:$4 sm:$0xff]  }
 0x480   :  { %1634 = vmatprep.subr.bf16.mxu0 %v3166_v59  ;;  %1726 = vmatprep.subr.bf16.mxu1 %v3166_v59  ;;  %v3203_v59 = vld [vmem:[%s4301_s5 + $0x1b0] ss:$8 sps:$4 sm:$0xff]  }
 0x483   :  { %1635 = vmatpush1.bf16.msra.mxu0 %v3164_v60  ;;  %1727 = vmatpush1.bf16.msra.mxu1 %v3164_v60  ;;  %v3208_v60 = vld [vmem:[%s4301_s5 + $0x1c4] ss:$8 sps:$4 sm:$0xff]  }
 0x484   :  { %1636 = vmatprep.subr.bf16.mxu0 %v3169_v63  ;;  %1728 = vmatprep.subr.bf16.mxu1 %v3169_v63  ;;  %v3211_v63 = vld [vmem:[%s4301_s5 + $0x1d4] ss:$8 sps:$4 sm:$0xff]  }
 0x487   :  { %1637 = vmatpush1.bf16.msra.mxu0 %v3167_v0  ;;  %1729 = vmatpush1.bf16.msra.mxu1 %v3167_v0 }
 0x488   :  { %1647 = vmatprep.subr.bf16.mxu0 %v3172_v1  ;;  %1739 = vmatprep.subr.bf16.mxu1 %v3172_v1  ;;  %v3209_v1 = vld [vmem:[%s4301_s5 + $0x1d0] ss:$8 sps:$4 sm:$0xff]  }
 0x506   :  { %v1231_v4 = vpop.xlane.xlu1 %1230 }
 0x507   :  { %v1232_v5 = vmul.f32 0.0034722222, %v1231_v4 }
 0x509   :  { %v1243_v15 = vmul.f32 %v1232_v5, %v1232_v5 }
 0x50a   :  { %v1241_v14 = vpop.xlane.xlu1 %1240 }
 0x50b   :  { %v1242_v16 = vmul.f32 0.0034722222, %v1241_v14 }
 0x50d   :  { %v1244_v17 = vsub.f32 %v1242_v16, %v1243_v15 }
 0x50f   :  { %v1245_v18 = vadd.f32 1e-05, %v1244_v17 }
 0x511   :  { %3300 = vrsqrt.f32 %v1245_v18 }
 0x51b   :  { %v3301_v20 = vpop.eup %3300 }
 0x51c   :  { %v1247_v21 = vmul.f32 %v3301_v20, %v3687_v19 }
 0x51e   :  { %1256 = vperm.xlu0 %3021, %v1247_v21   ;;  %v1248_v22 = vmul.f32 %v1247_v21, %v1232_v5 }
 0x520   :  { %1250 = vrot.lane.b32.xlu1 %v1248_v22, %s3311_s22 }
 0x522   :  { %3022 = vset.pattern.permute.xlu0 %v3310_v51 }
 0x592   :  { %v1251_v61 = vpop.permute.xlu1 %1250 }
 0x593   :  { %v1253_v62 = vsub.f32 %v3687_v19, %v1251_v61  ;;  %v1780_v61 = vlaneseq }
 0x595   :  { %1265 = vperm.xlu0 %3022, %v1253_v62   ;;  %v3206_v62 = vld [vmem:[%s4301_s5 + $0x1c0] ss:$8 sps:$4 sm:$0xff]   ;;  %v1781_v0 = vshrl.u32 %v1780_v61, 7  ;;  %v3247_v61 = vld [vmem:[%s4302_s6 + $0xf8] sm:$0xff]  }
 0x59d   :  { %v1257_v3 = vpop.permute.xlu0 %1256 }
 0x59e   :  { %v1259_v4 = vmul.f32 %v1257_v3, %v3664_v48  ;;  %v1260_v5 = vmul.f32 %v1257_v3, %v3670_v52  ;;  %v1261_v14 = vmul.f32 %v1257_v3, %v3666_v49  ;;  %v1262_v15 = vmul.f32 %v1257_v3, %v3672_v53  ;;  %v3170_v48 = vld [vmem:[%s4301_s5 + $0x100] ss:$8 sps:$4 sm:$0xff]   ;;  %v3214_v3 = vld [vmem:[%s4301_s5 + $0x1e4] ss:$8 sps:$4 sm:$0xff]  }
 0x614   :  { %v1266_v16 = vpop.permute.xlu0 %1265 }
 0x615   :  { %v1268_v17 = vadd.f32 %v1266_v16, %v1259_v4  ;;  %v1269_v18 = vadd.f32 %v1266_v16, %v1260_v5  ;;  %v1270_v19 = vadd.f32 %v1266_v16, %v1261_v14  ;;  %v1271_v20 = vadd.f32 %v1266_v16, %v1262_v15  ;;  %v3212_v5 = vld [vmem:[%s4301_s5 + $0x1e0] ss:$8 sps:$4 sm:$0xff]   ;;  %v3217_v14 = vld [vmem:[%s4301_s5 + $0x1f4] ss:$8 sps:$4 sm:$0xff]  }
 0x616   :  { %v3888_v4 = vsub.s32 0, %v1781_v0  ;;  %v3901_v16 = vld [vmem:[%s4303_s3 + $0x8] sm:$0xff] }
 0x617   :  { %v3796_v21 = vmax.f32 %v1268_v17, 0.0  ;;  %v3798_v22 = vmax.f32 %v1270_v19, 0.0  ;;  %v1273_v23 = vmax.f32 %v1269_v18, 0.0  ;;  %v1275_v24 = vmax.f32 %v1271_v20, 0.0  ;;  %v3215_v17 = vld [vmem:[%s4301_s5 + $0x1f0] ss:$8 sps:$4 sm:$0xff]  }
 0x618   :  { %v1787_v15 = vrot.slane %v3438_v8, %v3888_v4  ;;  %v3909_v18 = vld [vmem:[%s4303_s3 + $0x18] sm:$0xff]  ;;  %v2075_v0 = vrot.slane %v3442_v12, %v3888_v4 }
 0x619   :  { %v1283_v25 = vpack.c.bf16 %v1273_v23, %v1273_v23  ;;  %v1695_v52 = vpack.c.bf16 %v1275_v24, %v1275_v24  ;;  %v1282_v49 = vpack.c.bf16 %v3796_v21, %v3796_v21  ;;  %v1694_v53 = vpack.c.bf16 %v3798_v22, %v3798_v22 }
 0x61a   :  { %v1279_v26 = vrot.slane %v1273_v23, 4  ;;  %v1691_v27 = vrot.slane %v1275_v24, 4  ;;  %v1278_v19 = vrot.slane %v3796_v21, 4  ;;  %v1690_v20 = vrot.slane %v3798_v22, 4  ;;  %v3916_v23 = vld [vmem:[%s4302_s6 + $0x40] sm:$0xff]  }
 0x61b   :  { %1638 = vmatprep.mubr.bf16.mxu0 %v1283_v25  ;;  %1730 = vmatprep.mubr.bf16.mxu1 %v1695_v52  ;;  %v3921_v24 = vld [vmem:[%s4302_s6 + $0xc0] sm:$0xff]   ;;  %v1789_v25 = vmul.f32 %v1787_v15, %v3901_v16 }
 0x61c   :  { %1639 = vmatmul.mubr.bf16.vlgmr.msra.gmra.mrb[16].mxu0 %v1282_v49  ;;  %1731 = vmatmul.mubr.bf16.vlgmr.msra.gmra.mrb[16].mxu1 %v1694_v53  ;;  %v1285_v29 = vpack.c.bf16 %v1279_v26, %v1279_v26  ;;  %v1697_v30 = vpack.c.bf16 %v1691_v27, %v1691_v27  ;;  %v3928_v21 = vld [vmem:[%s4302_s6] sm:$0xff]   ;;  %v1284_v22 = vpack.c.bf16 %v1278_v19, %v1278_v19  ;;  %v3940_v26 = vld [vmem:[%s4302_s6 + $0x48] sm:$0xff]  }
 0x61d   :  { %1648 = vmatpush1.bf16.msra.mxu0 %v3170_v48  ;;  %1740 = vmatpush1.bf16.msra.mxu1 %v3170_v48  ;;  %v1791_v48 = vmul.f32 %v1787_v15, %v3909_v18  ;;  %v1696_v52 = vpack.c.bf16 %v1690_v20, %v1690_v20  ;;  %v3935_v49 = vld [vmem:[%s4302_s6 + $0x80] sm:$0xff]   ;;  %v1793_v53 = vpack.c.bf16 %v1789_v25, %v1789_v25  ;;  %v3945_v27 = vld [vmem:[%s4302_s6 + $0xc8] sm:$0xff]  }
 0x61e   :  { %1679 = vmatprep.mubr.bf16.mxu0 %v1285_v29  ;;  %1771 = vmatprep.mubr.bf16.mxu1 %v1697_v30  ;;  %v3951_v29 = vld [vmem:[%s4302_s6 + $0x8] sm:$0xff]   ;;  %v2077_v15 = vmul.f32 %v2075_v0, %v3901_v16  ;;  %v2071_v16 = vrot.slane %v3440_v11, %v3888_v4 }
 0x61f   :  { %1649 = vmatprep.subr.bf16.mxu0 %v3175_v28  ;;  %1741 = vmatprep.subr.bf16.mxu1 %v3175_v28  ;;  %v1795_v28 = vpack.c.bf16 %v1791_v48, %v1791_v48  ;;  %v3957_v30 = vld [vmem:[%s4302_s6 + $0x88] sm:$0xff]  }
 0x620   :  { %v2081_v25 = vpack.c.bf16 %v2077_v15, %v2077_v15  ;;  %v3256_v15 = vld [vmem:[%s4304_s7 + $0x20] ss:$8 sps:$4 sm:$0xff]  }
 0x621   :  { %1650 = vmatpush1.bf16.msra.mxu0 %v3173_v31  ;;  %1742 = vmatpush1.bf16.msra.mxu1 %v3173_v31  ;;  %v3962_v31 = vld [vmem:[%s4302_s6 + $0x50] sm:$0xff]  }
 0x622   :  { %1651 = vmatprep.subr.bf16.mxu0 %v3178_v32  ;;  %1743 = vmatprep.subr.bf16.mxu1 %v3178_v32  ;;  %v3969_v32 = vld [vmem:[%s4302_s6 + $0xd0] sm:$0xff]  }
 0x625   :  { %1652 = vmatpush1.bf16.msra.mxu0 %v3176_v34  ;;  %1744 = vmatpush1.bf16.msra.mxu1 %v3176_v34  ;;  %v3975_v34 = vld [vmem:[%s4302_s6 + $0x10] sm:$0xff]  }
 0x626   :  { %1653 = vmatprep.subr.bf16.mxu0 %v3181_v35  ;;  %1745 = vmatprep.subr.bf16.mxu1 %v3181_v35  ;;  %v3982_v35 = vld [vmem:[%s4302_s6 + $0x90] sm:$0xff]  }
 0x629   :  { %1654 = vmatpush1.bf16.msra.mxu0 %v3179_v36  ;;  %1746 = vmatpush1.bf16.msra.mxu1 %v3179_v36  ;;  %v3987_v36 = vld [vmem:[%s4302_s6 + $0x58] sm:$0xff]  }
 0x62a   :  { %1655 = vmatprep.subr.bf16.mxu0 %v3184_v37  ;;  %1747 = vmatprep.subr.bf16.mxu1 %v3184_v37  ;;  %v3993_v37 = vld [vmem:[%s4302_s6 + $0xd8] sm:$0xff]  }
 0x62d   :  { %1656 = vmatpush1.bf16.msra.mxu0 %v3182_v39  ;;  %1748 = vmatpush1.bf16.msra.mxu1 %v3182_v39  ;;  %v3999_v39 = vld [vmem:[%s4302_s6 + $0x18] sm:$0xff]  }
 0x62e   :  { %1657 = vmatprep.subr.bf16.mxu0 %v3187_v40  ;;  %1749 = vmatprep.subr.bf16.mxu1 %v3187_v40  ;;  %v4006_v40 = vld [vmem:[%s4302_s6 + $0x98] sm:$0xff]  }
 0x631   :  { %1658 = vmatpush1.bf16.msra.mxu0 %v3185_v41  ;;  %1750 = vmatpush1.bf16.msra.mxu1 %v3185_v41  ;;  %v4011_v41 = vld [vmem:[%s4302_s6 + $0x60] sm:$0xff]  }
 0x632   :  { %1659 = vmatprep.subr.bf16.mxu0 %v3190_v42  ;;  %1751 = vmatprep.subr.bf16.mxu1 %v3190_v42  ;;  %v4017_v42 = vld [vmem:[%s4302_s6 + $0xe0] sm:$0xff]  }
 0x635   :  { %1660 = vmatpush1.bf16.msra.mxu0 %v3188_v44  ;;  %1752 = vmatpush1.bf16.msra.mxu1 %v3188_v44  ;;  %v4023_v44 = vld [vmem:[%s4302_s6 + $0x20] sm:$0xff]  }
 0x636   :  { %1661 = vmatprep.subr.bf16.mxu0 %v3193_v45  ;;  %1753 = vmatprep.subr.bf16.mxu1 %v3193_v45  ;;  %v3237_v45 = vld [vmem:[%s4302_s6 + $0xa0] sm:$0xff]  }
 0x639   :  { %1662 = vmatpush1.bf16.msra.mxu0 %v3191_v46  ;;  %1754 = vmatpush1.bf16.msra.mxu1 %v3191_v46  ;;  %v3238_v46 = vld [vmem:[%s4302_s6 + $0x68] sm:$0xff]  }
 0x63a   :  { %1663 = vmatprep.subr.bf16.mxu0 %v3196_v47  ;;  %1755 = vmatprep.subr.bf16.mxu1 %v3196_v47  ;;  %v3239_v47 = vld [vmem:[%s4302_s6 + $0xe8] sm:$0xff]  }
 0x63d   :  { %1664 = vmatpush1.bf16.msra.mxu0 %v3194_v50  ;;  %1756 = vmatpush1.bf16.msra.mxu1 %v3194_v50  ;;  %v3240_v50 = vld [vmem:[%s4302_s6 + $0x28] sm:$0xff]  }
 0x63e   :  { %1665 = vmatprep.subr.bf16.mxu0 %v3199_v54  ;;  %1757 = vmatprep.subr.bf16.mxu1 %v3199_v54  ;;  %v3241_v54 = vld [vmem:[%s4302_s6 + $0xa8] sm:$0xff]  }
 0x641   :  { %1666 = vmatpush1.bf16.msra.mxu0 %v3197_v55  ;;  %1758 = vmatpush1.bf16.msra.mxu1 %v3197_v55  ;;  %v3242_v55 = vld [vmem:[%s4302_s6 + $0x70] sm:$0xff]  }
 0x642   :  { %1667 = vmatprep.subr.bf16.mxu0 %v3202_v56  ;;  %1759 = vmatprep.subr.bf16.mxu1 %v3202_v56  ;;  %v3243_v56 = vld [vmem:[%s4302_s6 + $0xf0] sm:$0xff]  }
 0x645   :  { %1668 = vmatpush1.bf16.msra.mxu0 %v3200_v57  ;;  %1760 = vmatpush1.bf16.msra.mxu1 %v3200_v57  ;;  %v3244_v57 = vld [vmem:[%s4302_s6 + $0x30] sm:$0xff]  }
 0x646   :  { %1669 = vmatprep.subr.bf16.mxu0 %v3205_v58  ;;  %1761 = vmatprep.subr.bf16.mxu1 %v3205_v58  ;;  %v3245_v58 = vld [vmem:[%s4302_s6 + $0xb0] sm:$0xff]  }
 0x649   :  { %1670 = vmatpush1.bf16.msra.mxu0 %v3203_v59  ;;  %1762 = vmatpush1.bf16.msra.mxu1 %v3203_v59  ;;  %v3246_v59 = vld [vmem:[%s4302_s6 + $0x78] sm:$0xff]  }
 0x64a   :  { %1671 = vmatprep.subr.bf16.mxu0 %v3208_v60  ;;  %1763 = vmatprep.subr.bf16.mxu1 %v3208_v60  ;;  %v1783_v60 = vrot.slane %v3436_v6, %v3888_v4 }
 0x64d   :  { %1672 = vmatpush1.bf16.msra.mxu0 %v3206_v62  ;;  %1764 = vmatpush1.bf16.msra.mxu1 %v3206_v62  ;;  %v47_v62 = vld [vmem:[%s4303_s3] sm:$0xff] }
 0x64e   :  { %1673 = vmatprep.subr.bf16.mxu0 %v3211_v63  ;;  %1765 = vmatprep.subr.bf16.mxu1 %v3211_v63  ;;  %v49_v63 = vld [vmem:[%s4303_s3 + $0x10] sm:$0xff] }
 0x651   :  { %1674 = vmatpush1.bf16.msra.mxu0 %v3209_v1  ;;  %1766 = vmatpush1.bf16.msra.mxu1 %v3209_v1  ;;  %v3248_v1 = vld [vmem:[%s4302_s6 + $0x38] sm:$0xff]  }
 0x652   :  { %1675 = vmatprep.subr.bf16.mxu0 %v3214_v3  ;;  %1767 = vmatprep.subr.bf16.mxu1 %v3214_v3  ;;  %v3249_v3 = vld [vmem:[%s4302_s6 + $0xb8] sm:$0xff]  }
 0x655   :  { %1676 = vmatpush1.bf16.msra.mxu0 %v3212_v5  ;;  %1768 = vmatpush1.bf16.msra.mxu1 %v3212_v5  ;;  %v1788_v5 = vmul.f32 %v1783_v60, %v47_v62 }
 0x656   :  { %1677 = vmatprep.subr.bf16.mxu0 %v3217_v14  ;;  %1769 = vmatprep.subr.bf16.mxu1 %v3217_v14  ;;  %v1790_v14 = vmul.f32 %v1783_v60, %v49_v63 }
 0x657   :  { %v1792_v19 = vpack.c.bf16 %v1788_v5, %v1788_v5  ;;  %v3252_v5 = vld [vmem:[%s4304_s7 + $0x4] ss:$8 sps:$4 sm:$0xff]  }
 0x658   :  { %v1794_v20 = vpack.c.bf16 %v1790_v14, %v1790_v14  ;;  %v3255_v14 = vld [vmem:[%s4304_s7 + $0x14] ss:$8 sps:$4 sm:$0xff]  }
 0x659   :  { %1678 = vmatpush1.bf16.msra.mxu0 %v3215_v17  ;;  %1770 = vmatpush1.bf16.msra.mxu1 %v3215_v17  ;;  %v2079_v17 = vmul.f32 %v2075_v0, %v3909_v18  ;;  %v2076_v18 = vmul.f32 %v2071_v16, %v47_v62  ;;  %v4114_v62 = vld [vmem:[%s4299_s2 + $0x18] sm:$0xff] }
 0x65a   :  { %2895 = vmatprep.subr.bf16.mxu0 %v3916_v23  ;;  %2917 = vmatprep.subr.bf16.mxu1 %v3921_v24 }
 0x65b   :  { %v2083_v48 = vpack.c.bf16 %v2079_v17, %v2079_v17  ;;  %v3261_v17 = vld [vmem:[%s4304_s7 + $0x34] ss:$8 sps:$4 sm:$0xff]  }
 0x65c   :  { %1680 = vmatmul.mubr.bf16.vlgmr.msra.gmra.mrb[16].mxu0 %v1284_v22  ;;  %1772 = vmatmul.mubr.bf16.vlgmr.msra.gmra.mrb[16].mxu1 %v1696_v52 }
 0x65d   :  { %2896 = vmatpush3.bf16.msra.mxu0 %v3928_v21  ;;  %2020 = vmatprep.mubr.bf16.mxu0 %v1793_v53 }
 0x65e   :  { %2918 = vmatpush3.bf16.msra.mxu1 %v3935_v49  ;;  %2060 = vmatprep.mubr.bf16.mxu1 %v1795_v28 }
 0x65f   :  { %2897 = vmatprep.subr.bf16.mxu0 %v3940_v26  ;;  %2919 = vmatprep.subr.bf16.mxu1 %v3945_v27 }
 0x661   :  { %2898 = vmatpush3.bf16.msra.mxu0 %v3951_v29 }
 0x662   :  { %2920 = vmatpush3.bf16.msra.mxu1 %v3957_v30  ;;  %2899 = vmatprep.subr.bf16.mxu0 %v3962_v31 }
 0x663   :  { %2921 = vmatprep.subr.bf16.mxu1 %v3969_v32 }
 0x665   :  { %2900 = vmatpush3.bf16.msra.mxu0 %v3975_v34 }
 0x666   :  { %2922 = vmatpush3.bf16.msra.mxu1 %v3982_v35  ;;  %2901 = vmatprep.subr.bf16.mxu0 %v3987_v36 }
 0x667   :  { %2923 = vmatprep.subr.bf16.mxu1 %v3993_v37 }
 0x669   :  { %2902 = vmatpush3.bf16.msra.mxu0 %v3999_v39 }
 0x66a   :  { %2924 = vmatpush3.bf16.msra.mxu1 %v4006_v40  ;;  %2903 = vmatprep.subr.bf16.mxu0 %v4011_v41 }
 0x66b   :  { %2925 = vmatprep.subr.bf16.mxu1 %v4017_v42 }
 0x66d   :  { %2904 = vmatpush3.bf16.msra.mxu0 %v4023_v44 }
 0x66e   :  { %2926 = vmatpush3.bf16.msra.mxu1 %v3237_v45  ;;  %2905 = vmatprep.subr.bf16.mxu0 %v3238_v46 }
 0x66f   :  { %2927 = vmatprep.subr.bf16.mxu1 %v3239_v47 }
 0x671   :  { %2906 = vmatpush3.bf16.msra.mxu0 %v3240_v50 }
 0x672   :  { %2928 = vmatpush3.bf16.msra.mxu1 %v3241_v54  ;;  %2907 = vmatprep.subr.bf16.mxu0 %v3242_v55 }
 0x673   :  { %2929 = vmatprep.subr.bf16.mxu1 %v3243_v56 }
 0x675   :  { %2908 = vmatpush3.bf16.msra.mxu0 %v3244_v57 }
 0x676   :  { %2930 = vmatpush3.bf16.msra.mxu1 %v3245_v58  ;;  %2909 = vmatprep.subr.bf16.mxu0 %v3246_v59 }
 0x677   :  { %2931 = vmatprep.subr.bf16.mxu1 %v3247_v61 }
 0x679   :  { %2910 = vmatpush3.bf16.msra.mxu0 %v3248_v1 }
 0x67a   :  { %2932 = vmatpush3.bf16.msra.mxu1 %v3249_v3  ;;  %2939 = vmatprep.subr.bf16.mxu0 %v3916_v23  ;;  %v2078_v23 = vmul.f32 %v2071_v16, %v49_v63  ;;  %v3265_v16 = vld [vmem:[%s4304_s7 + $0x50] ss:$8 sps:$4 sm:$0xff]  }
 0x67b   :  { %2961 = vmatprep.subr.bf16.mxu1 %v3921_v24  ;;  %v2080_v24 = vpack.c.bf16 %v2076_v18, %v2076_v18  ;;  %v3270_v18 = vld [vmem:[%s4304_s7 + $0x64] ss:$8 sps:$4 sm:$0xff]  }
 0x67c   :  { %2021 = vmatmul.mubr.bf16.vlgmr.msra.gmra.mrb[20].mxu0 %v1792_v19  ;;  %v3259_v19 = vld [vmem:[%s4304_s7 + $0x30] ss:$8 sps:$4 sm:$0xff]  }
 0x67d   :  { %2061 = vmatmul.mubr.bf16.vlgmr.msra.gmra.mrb[20].mxu1 %v1794_v20  ;;  %2940 = vmatpush3.bf16.msra.mxu0 %v3928_v21  ;;  %v2082_v21 = vpack.c.bf16 %v2078_v23, %v2078_v23  ;;  %v3264_v20 = vld [vmem:[%s4304_s7 + $0x44] ss:$8 sps:$4 sm:$0xff]   ;;  %v3268_v23 = vld [vmem:[%s4304_s7 + $0x60] ss:$8 sps:$4 sm:$0xff]  }
 0x67e   :  { %2116 = vmatprep.mubr.bf16.mxu0 %v2081_v25  ;;  %2962 = vmatpush3.bf16.msra.mxu1 %v3935_v49  ;;  %v3262_v25 = vld [vmem:[%s4304_s7 + $0x40] ss:$8 sps:$4 sm:$0xff]  }
 0x67f   :  { %2156 = vmatprep.mubr.bf16.mxu1 %v2083_v48  ;;  %2941 = vmatprep.subr.bf16.mxu0 %v3940_v26  ;;  %v3267_v48 = vld [vmem:[%s4304_s7 + $0x54] ss:$8 sps:$4 sm:$0xff]  }
 0x680   :  { %2963 = vmatprep.subr.bf16.mxu1 %v3945_v27 }
 0x681   :  { %2942 = vmatpush3.bf16.msra.mxu0 %v3951_v29 }
 0x682   :  { %2964 = vmatpush3.bf16.msra.mxu1 %v3957_v30  ;;  %2943 = vmatprep.subr.bf16.mxu0 %v3962_v31 }
 0x683   :  { %2965 = vmatprep.subr.bf16.mxu1 %v3969_v32 }
 0x685   :  { %2944 = vmatpush3.bf16.msra.mxu0 %v3975_v34 }
 0x686   :  { %2966 = vmatpush3.bf16.msra.mxu1 %v3982_v35  ;;  %2945 = vmatprep.subr.bf16.mxu0 %v3987_v36 }
 0x687   :  { %2967 = vmatprep.subr.bf16.mxu1 %v3993_v37 }
 0x689   :  { %2946 = vmatpush3.bf16.msra.mxu0 %v3999_v39 }
 0x68a   :  { %2968 = vmatpush3.bf16.msra.mxu1 %v4006_v40  ;;  %2947 = vmatprep.subr.bf16.mxu0 %v4011_v41 }
 0x68b   :  { %2969 = vmatprep.subr.bf16.mxu1 %v4017_v42 }
 0x68d   :  { %2948 = vmatpush3.bf16.msra.mxu0 %v4023_v44 }
 0x68e   :  { %2970 = vmatpush3.bf16.msra.mxu1 %v3237_v45  ;;  %2949 = vmatprep.subr.bf16.mxu0 %v3238_v46 }
 0x68f   :  { %2971 = vmatprep.subr.bf16.mxu1 %v3239_v47 }
 0x691   :  { %2950 = vmatpush3.bf16.msra.mxu0 %v3240_v50 }
 0x692   :  { %2972 = vmatpush3.bf16.msra.mxu1 %v3241_v54  ;;  %2951 = vmatprep.subr.bf16.mxu0 %v3242_v55 }
 0x693   :  { %2973 = vmatprep.subr.bf16.mxu1 %v3243_v56 }
 0x695   :  { %2952 = vmatpush3.bf16.msra.mxu0 %v3244_v57 }
 0x696   :  { %2974 = vmatpush3.bf16.msra.mxu1 %v3245_v58  ;;  %2953 = vmatprep.subr.bf16.mxu0 %v3246_v59 }
 0x697   :  { %2975 = vmatprep.subr.bf16.mxu1 %v3247_v61 }
 0x699   :  { %2954 = vmatpush3.bf16.msra.mxu0 %v3248_v1 }
 0x69a   :  { %2976 = vmatpush3.bf16.msra.mxu1 %v3249_v3  ;;  %v3250_v3 = vld [vmem:[%s4304_s7] ss:$8 sps:$4 sm:$0xff]   ;;  %2366 = vmatprep.subr.bf16.mxu0 %v3252_v5 }
 0x69b   :  { %2412 = vmatprep.subr.bf16.mxu1 %v3252_v5 }
 0x69c   :  { %2117 = vmatmul.mubr.bf16.vlgmr.msra.gmra.mrb[24].mxu0 %v2080_v24  ;;  %v3273_v24 = vld [vmem:[%s4304_s7 + $0x74] ss:$8 sps:$4 sm:$0xff]  }
 0x69d   :  { %2157 = vmatmul.mubr.bf16.vlgmr.msra.gmra.mrb[24].mxu1 %v2082_v21  ;;  %2367 = vmatpush1.bf16.msra.mxu0 %v3250_v3  ;;  %v3271_v21 = vld [vmem:[%s4304_s7 + $0x70] ss:$8 sps:$4 sm:$0xff]  }
 0x69e   :  { %2413 = vmatpush1.bf16.msra.mxu1 %v3250_v3  ;;  %2368 = vmatprep.subr.bf16.mxu0 %v3255_v14 }
 0x69f   :  { %2414 = vmatprep.subr.bf16.mxu1 %v3255_v14 }
 0x74f   :  { %v2911_v22 = vpop.f32.mrb[20].mxu0 }
 0x750   :  { %v2933_v52 = vpop.f32.mrb[20].mxu1  ;;  %v2912_v49 = vpop.f32.mrb[21].mxu0 }
 0x751   :  { %v2913_v53 = vadd.f32 %v2912_v49, %v2911_v22  ;;  %v2934_v26 = vpop.f32.mrb[21].mxu1  ;;  %v2914_v27 = vpop.f32.mrb[22].mxu0  ;;  %v3276_v22 = vld [vmem:[%s4304_s7 + $0x84] ss:$8 sps:$4 sm:$0xff]   ;;  %v3279_v49 = vld [vmem:[%s4304_s7 + $0x94] ss:$8 sps:$4 sm:$0xff]  }
 0x752   :  { %v2935_v4 = vadd.f32 %v2934_v26, %v2933_v52  ;;  %v2936_v28 = vpop.f32.mrb[22].mxu1  ;;  %v2915_v29 = vpop.f32.mrb[23].mxu0  ;;  %v3274_v52 = vld [vmem:[%s4304_s7 + $0x80] ss:$8 sps:$4 sm:$0xff]   ;;  %v3282_v26 = vld [vmem:[%s4304_s7 + $0xa4] ss:$8 sps:$4 sm:$0xff]  }
 0x753   :  { %v2937_v30 = vpop.f32.mrb[23].mxu1  ;;  %v3280_v27 = vld [vmem:[%s4304_s7 + $0xa0] ss:$8 sps:$4 sm:$0xff]   ;;  %v3283_v28 = vld [vmem:[%s4304_s7 + $0xb0] ss:$8 sps:$4 sm:$0xff]  }
 0x754   :  { %v4101_v31 = vadd.f32 %v2935_v4, %v2913_v53  ;;  %v3277_v53 = vld [vmem:[%s4304_s7 + $0x90] ss:$8 sps:$4 sm:$0xff]   ;;  %v3285_v4 = vld [vmem:[%s4304_s7 + $0xb4] ss:$8 sps:$4 sm:$0xff]   ;;  %v3288_v29 = vld [vmem:[%s4304_s7 + $0xc4] ss:$8 sps:$4 sm:$0xff]  }
 0x755   :  { %v3286_v30 = vld [vmem:[%s4304_s7 + $0xc0] ss:$8 sps:$4 sm:$0xff]  }
 0x756   :  { %v2168_v47 = vmul.f32 %v4101_v31, %v4101_v31 }
 0x76f   :  { %v2955_v32 = vpop.f32.mrb[24].mxu0 }
 0x770   :  { %v2977_v34 = vpop.f32.mrb[24].mxu1  ;;  %v2956_v35 = vpop.f32.mrb[25].mxu0 }
 0x771   :  { %v2957_v36 = vadd.f32 %v2956_v35, %v2955_v32  ;;  %v2978_v37 = vpop.f32.mrb[25].mxu1  ;;  %v2958_v39 = vpop.f32.mrb[26].mxu0  ;;  %v3291_v32 = vld [vmem:[%s4304_s7 + $0xd4] ss:$8 sps:$4 sm:$0xff]  }
 0x772   :  { %v2979_v40 = vadd.f32 %v2978_v37, %v2977_v34  ;;  %v2980_v41 = vpop.f32.mrb[26].mxu1  ;;  %v2959_v42 = vpop.f32.mrb[27].mxu0  ;;  %v3289_v34 = vld [vmem:[%s4304_s7 + $0xd0] ss:$8 sps:$4 sm:$0xff]   ;;  %v3294_v37 = vld [vmem:[%s4304_s7 + $0xe4] ss:$8 sps:$4 sm:$0xff]  }
 0x773   :  { %v2981_v44 = vpop.f32.mrb[27].mxu1  ;;  %v3292_v39 = vld [vmem:[%s4304_s7 + $0xe0] ss:$8 sps:$4 sm:$0xff]   ;;  %v3297_v41 = vld [vmem:[%s4304_s7 + $0xf4] ss:$8 sps:$4 sm:$0xff]  }
 0x774   :  { %v4103_v45 = vadd.f32 %v2979_v40, %v2957_v36  ;;  %v3295_v40 = vld [vmem:[%s4304_s7 + $0xf0] ss:$8 sps:$4 sm:$0xff]  }
 0x776   :  { %v2164_v46 = vadd.f32 %v4103_v45, %v4101_v31  ;;  %v2169_v50 = vmul.f32 %v4103_v45, %v4103_v45 }
 0x778   :  { %2165 = vadd.xlane.f32.xlu1 %v2164_v46  ;;  %v2170_v54 = vadd.f32 %v2169_v50, %v2168_v47 }
 0x77a   :  { %2171 = vadd.xlane.f32.xlu0 %v2170_v54 }
 0x805   :  { %v2166_v55 = vpop.xlane.xlu1 %2165 }
 0x806   :  { %v2167_v56 = vmul.f32 0.0125, %v2166_v55 }
 0x807   :  { %v2172_v57 = vpop.xlane.xlu0 %2171 }
 0x808   :  { %v2174_v58 = vmul.f32 %v2167_v56, %v2167_v56  ;;  %v2173_v59 = vmul.f32 0.0125, %v2172_v57 }
 0x80a   :  { %v2175_v60 = vsub.f32 %v2173_v59, %v2174_v58 }
 0x80c   :  { %v2176_v61 = vadd.f32 1e-05, %v2175_v60 }
 0x80e   :  { %3302 = vrsqrt.f32 %v2176_v61 }
 0x818   :  { %v3303_v63 = vpop.eup %3302 }
 0x819   :  { %v2178_v0 = vmul.f32 %v3303_v63, %v4114_v62 }
 0x81b   :  { %2187 = vperm.xlu1 %3019, %v2178_v0   ;;  %v2179_v1 = vmul.f32 %v2178_v0, %v2167_v56 }
 0x81d   :  { %2181 = vrot.lane.b32.xlu0 %v2179_v1, %s3311_s22 }
 0x81f   :  { %3023 = vset.pattern.permute.xlu1 %v3310_v51 }
 0x83c   :  { %454 = vadd.xlane.f32.xlu0 %v3416_v33  ;;  %v3253_v33 = vld [vmem:[%s4304_s7 + $0x10] ss:$8 sps:$4 sm:$0xff]  }
 0x83d   :  { %2369 = vmatpush1.bf16.msra.mxu0 %v3253_v33  ;;  %2415 = vmatpush1.bf16.msra.mxu1 %v3253_v33 }
 0x840   :  { %464 = vadd.xlane.f32.xlu0 %v3419_v38  ;;  %v3258_v38 = vld [vmem:[%s4304_s7 + $0x24] ss:$8 sps:$4 sm:$0xff]  }
 0x841   :  { %2370 = vmatprep.subr.bf16.mxu0 %v3258_v38  ;;  %2416 = vmatprep.subr.bf16.mxu1 %v3258_v38 }
 0x842   :  { %2371 = vmatpush1.bf16.msra.mxu0 %v3256_v15  ;;  %2417 = vmatpush1.bf16.msra.mxu1 %v3256_v15 }
 0x843   :  { %2372 = vmatprep.subr.bf16.mxu0 %v3261_v17  ;;  %2418 = vmatprep.subr.bf16.mxu1 %v3261_v17 }
 0x846   :  { %2373 = vmatpush1.bf16.msra.mxu0 %v3259_v19  ;;  %2419 = vmatpush1.bf16.msra.mxu1 %v3259_v19 }
 0x847   :  { %2374 = vmatprep.subr.bf16.mxu0 %v3264_v20  ;;  %2420 = vmatprep.subr.bf16.mxu1 %v3264_v20 }
 0x84a   :  { %2375 = vmatpush1.bf16.msra.mxu0 %v3262_v25  ;;  %2421 = vmatpush1.bf16.msra.mxu1 %v3262_v25 }
 0x84b   :  { %2376 = vmatprep.subr.bf16.mxu0 %v3267_v48  ;;  %2422 = vmatprep.subr.bf16.mxu1 %v3267_v48 }
 0x84e   :  { %2377 = vmatpush1.bf16.msra.mxu0 %v3265_v16  ;;  %2423 = vmatpush1.bf16.msra.mxu1 %v3265_v16 }
 0x84f   :  { %2378 = vmatprep.subr.bf16.mxu0 %v3270_v18  ;;  %2424 = vmatprep.subr.bf16.mxu1 %v3270_v18 }
 0x852   :  { %2379 = vmatpush1.bf16.msra.mxu0 %v3268_v23  ;;  %2425 = vmatpush1.bf16.msra.mxu1 %v3268_v23 }
 0x853   :  { %2380 = vmatprep.subr.bf16.mxu0 %v3273_v24  ;;  %2426 = vmatprep.subr.bf16.mxu1 %v3273_v24 }
 0x856   :  { %2381 = vmatpush1.bf16.msra.mxu0 %v3271_v21  ;;  %2427 = vmatpush1.bf16.msra.mxu1 %v3271_v21 }
 0x857   :  { %2382 = vmatprep.subr.bf16.mxu0 %v3276_v22  ;;  %2428 = vmatprep.subr.bf16.mxu1 %v3276_v22 }
 0x85a   :  { %2383 = vmatpush1.bf16.msra.mxu0 %v3274_v52  ;;  %2429 = vmatpush1.bf16.msra.mxu1 %v3274_v52 }
 0x85b   :  { %2384 = vmatprep.subr.bf16.mxu0 %v3279_v49  ;;  %2430 = vmatprep.subr.bf16.mxu1 %v3279_v49 }
 0x85e   :  { %2385 = vmatpush1.bf16.msra.mxu0 %v3277_v53  ;;  %2431 = vmatpush1.bf16.msra.mxu1 %v3277_v53 }
 0x85f   :  { %2386 = vmatprep.subr.bf16.mxu0 %v3282_v26  ;;  %2432 = vmatprep.subr.bf16.mxu1 %v3282_v26 }
 0x862   :  { %2387 = vmatpush1.bf16.msra.mxu0 %v3280_v27  ;;  %2433 = vmatpush1.bf16.msra.mxu1 %v3280_v27 }
 0x863   :  { %2388 = vmatprep.subr.bf16.mxu0 %v3285_v4  ;;  %2434 = vmatprep.subr.bf16.mxu1 %v3285_v4 }
 0x866   :  { %2389 = vmatpush1.bf16.msra.mxu0 %v3283_v28  ;;  %2435 = vmatpush1.bf16.msra.mxu1 %v3283_v28 }
 0x867   :  { %2390 = vmatprep.subr.bf16.mxu0 %v3288_v29  ;;  %2436 = vmatprep.subr.bf16.mxu1 %v3288_v29  ;;  %v32_v29 = vld [vmem:[%s4299_s2] sm:$0xff] }
 0x86a   :  { %2391 = vmatpush1.bf16.msra.mxu0 %v3286_v30  ;;  %2437 = vmatpush1.bf16.msra.mxu1 %v3286_v30 }
 0x86b   :  { %2392 = vmatprep.subr.bf16.mxu0 %v3291_v32  ;;  %2438 = vmatprep.subr.bf16.mxu1 %v3291_v32 }
 0x86e   :  { %2393 = vmatpush1.bf16.msra.mxu0 %v3289_v34  ;;  %2439 = vmatpush1.bf16.msra.mxu1 %v3289_v34 }
 0x86f   :  { %2394 = vmatprep.subr.bf16.mxu0 %v3294_v37  ;;  %2440 = vmatprep.subr.bf16.mxu1 %v3294_v37 }
 0x872   :  { %2395 = vmatpush1.bf16.msra.mxu0 %v3292_v39  ;;  %2441 = vmatpush1.bf16.msra.mxu1 %v3292_v39 }
 0x873   :  { %2396 = vmatprep.subr.bf16.mxu0 %v3297_v41  ;;  %2442 = vmatprep.subr.bf16.mxu1 %v3297_v41 }
 0x876   :  { %2397 = vmatpush1.bf16.msra.mxu0 %v3295_v40  ;;  %2443 = vmatpush1.bf16.msra.mxu1 %v3295_v40 }
 0x88f   :  { %v2182_v35 = vpop.permute.xlu0 %2181 }
 0x890   :  { %v2184_v36 = vsub.f32 %v4114_v62, %v2182_v35 }
 0x892   :  { %2194 = vperm.xlu1 %3023, %v2184_v36  }
 0x896   :  { %3024 = vset.pattern.permute.xlu1 %v3309_v43 }
 0x89a   :  { %v2188_v42 = vpop.permute.xlu1 %2187 }
 0x89b   :  { %v2190_v44 = vmul.f32 %v2188_v42, %v4101_v31  ;;  %v2191_v46 = vmul.f32 %v2188_v42, %v4103_v45  ;;  %v36_v42 = vld [vmem:[%s4299_s2 + $0x20] sm:$0xff] }
 0x911   :  { %v2195_v47 = vpop.permute.xlu1 %2194 }
 0x912   :  { %v2197_v50 = vadd.f32 %v2195_v47, %v2190_v44  ;;  %v2198_v54 = vadd.f32 %v2195_v47, %v2191_v46 }
 0x914   :  { %v2199_v55 = vmax.f32 %v2197_v50, 0.0  ;;  %v2200_v56 = vmax.f32 %v2198_v54, 0.0 }
 0x916   :  { %v2202_v57 = vrot.slane %v2199_v55, 4  ;;  %v2408_v58 = vrot.slane %v2200_v56, 4  ;;  %v2204_v61 = vpack.c.bf16 %v2199_v55, %v2199_v55  ;;  %v2410_v43 = vpack.c.bf16 %v2200_v56, %v2200_v56 }
 0x918   :  { %v2205_v59 = vpack.c.bf16 %v2202_v57, %v2202_v57  ;;  %v2411_v60 = vpack.c.bf16 %v2408_v58, %v2408_v58 }
 0x91a   :  { %2398 = vmatprep.mubr.bf16.mxu0 %v2205_v59  ;;  %2444 = vmatprep.mubr.bf16.mxu1 %v2411_v60 }
 0x91b   :  { %2399 = vmatmul.mubr.bf16.vlgmr.msra.gmra.mrb[16].mxu0 %v2204_v61  ;;  %2445 = vmatmul.mubr.bf16.vlgmr.msra.gmra.mrb[16].mxu1 %v2410_v43 }
 0x91c   :  { %2540 = vmatprep.mubr.f32.mxu0 %v3308_v2  ;;  %2611 = vmatprep.mubr.f32.mxu1 %v3308_v2  ;;  %v46_v2 = vld [vmem:[%s4298_s1 + $0x28] sm:$0xff] }
 0x9ee   :  { %v2400_v31 = vpop.f32.mrb[16].mxu0  ;;  %v2446_v45 = vpop.f32.mrb[16].mxu1 }
 0x9ef   :  { %v2402_v62 = vpop.f32.mrb[17].mxu0  ;;  %v2448_v63 = vpop.f32.mrb[17].mxu1  ;;  %v2983_v14 = vadd.f32 %v2400_v31, %v3436_v6  ;;  %v2985_v33 = vadd.f32 %v2446_v45, %v3440_v11 }
 0x9f0   :  { %v2984_v0 = vadd.f32 %v2402_v62, %v3438_v8  ;;  %v2986_v1 = vadd.f32 %v2448_v63, %v3442_v12  ;;  %v2404_v3 = vpop.f32.mrb[18].mxu0  ;;  %v2450_v5 = vpop.f32.mrb[18].mxu1 }
 0x9f1   :  { %v2405_v38 = vpop.f32.mrb[19].mxu0  ;;  %v2451_v15 = vpop.f32.mrb[19].mxu1 }
 0x9f2   :  { %2889 = vmatprep.subr.msk.mxu0 %vm504_vm1, %v2984_v0  ;;  %2892 = vmatprep.subr.msk.mxu1 %vm504_vm1, %v2986_v1  ;;  %v455_v6 = vpop.xlane.xlu0 %454 }
 0x9f3   :  { %2890 = vmatpush1.msk.msra.mxu0 %vm504_vm1, %v2983_v14  ;;  %2893 = vmatpush1.msk.msra.mxu1 %vm504_vm1, %v2985_v33  ;;  %v456_v11 = vmul.f32 0.001953125, %v455_v6 }
 0x9f4   :  { %2891 = vmatmul.mubr.msk.f32.vlgmr.msra.gmra.mrb[4].mxu0 %vm562_vm2, %v46_v2  ;;  %2894 = vmatmul.mubr.msk.f32.vlgmr.msra.gmra.mrb[4].mxu1 %vm562_vm2, %v46_v2 }
 0x9f5   :  { %v467_v17 = vmul.f32 %v456_v11, %v456_v11 }
 0x9f6   :  { %v465_v8 = vpop.xlane.xlu0 %464 }
 0x9f7   :  { %v466_v12 = vmul.f32 0.001953125, %v465_v8 }
 0x9f9   :  { %v468_v19 = vsub.f32 %v466_v12, %v467_v17 }
 0x9fb   :  { %v469_v23 = vadd.f32 1e-05, %v468_v19 }
 0x9fd   :  { %3304 = vrsqrt.f32 %v469_v23 }
 0xa07   :  { %v3305_v28 = vpop.eup %3304 }
 0xa08   :  { %v471_v30 = vmul.f32 %v3305_v28, %v32_v29 }
 0xa0a   :  { %v472_v32 = vmul.f32 %v471_v30, %v456_v11 }
 0xac7   :  { %v4236_v20 = vpop.f32.mrb[4].mxu0  ;;  %v4238_v25 = vpop.f32.mrb[4].mxu1 }
 0xac8   :  { %v2628_v48 = vmul.f32 %v4236_v20, %v4236_v20  ;;  %v4242_v16 = vpop.f32.mrb[5].mxu0  ;;  %v4244_v18 = vpop.f32.mrb[5].mxu1  ;;  %v2630_v22 = vmul.f32 %v4238_v25, %v4238_v25 }
 0xac9   :  { %v2622_v24 = vadd.f32 %v4242_v16, %v4236_v20  ;;  %v2629_v21 = vmul.f32 %v4242_v16, %v4242_v16  ;;  %v2631_v53 = vmul.f32 %v4244_v18, %v4244_v18 }
 0xacb   :  { %v2632_v52 = vadd.f32 %v2629_v21, %v2628_v48  ;;  %v2623_v49 = vadd.f32 %v2622_v24, %v4238_v25 }
 0xacd   :  { %v2624_v26 = vadd.f32 %v2623_v49, %v4244_v18  ;;  %v2633_v27 = vadd.f32 %v2632_v52, %v2630_v22 }
 0xacf   :  { %2625 = vadd.xlane.f32.xlu1 %v2624_v26  ;;  %v2634_v4 = vadd.f32 %v2633_v27, %v2631_v53 }
 0xad1   :  { %2635 = vadd.xlane.f32.xlu0 %v2634_v4 }
 0xae0   :  { %474 = vrot.lane.b32.xlu1 %v472_v32, %s3311_s22 }
 0xae4   :  { %480 = vperm.xlu1 %3024, %v471_v30  }
 0xb5c   :  { %v2626_v34 = vpop.xlane.xlu1 %2625 }
 0xb5d   :  { %v2627_v35 = vmul.f32 0.001953125, %v2626_v34 }
 0xb5e   :  { %v2636_v36 = vpop.xlane.xlu0 %2635 }
 0xb5f   :  { %v2638_v37 = vmul.f32 %v2627_v35, %v2627_v35  ;;  %v2637_v39 = vmul.f32 0.001953125, %v2636_v36 }
 0xb60   :  { %v475_v50 = vpop.permute.xlu1 %474 }
 0xb61   :  { %v2639_v40 = vsub.f32 %v2637_v39, %v2638_v37  ;;  %v477_v54 = vsub.f32 %v32_v29, %v475_v50 }
 0xb63   :  { %v2640_v41 = vadd.f32 1e-05, %v2639_v40 }
 0xb64   :  { %v481_v57 = vpop.permute.xlu1 %480 }
 0xb65   :  { %3306 = vrsqrt.f32 %v2640_v41  ;;  %v483_v58 = vmul.f32 %v481_v57, %v3390_v7  ;;  %v484_v59 = vmul.f32 %v481_v57, %v3394_v9  ;;  %v485_v60 = vmul.f32 %v481_v57, %v3396_v10 }
 0xb66   :  { %v486_v61 = vmul.f32 %v481_v57, %v3402_v13 }
 0xb6f   :  { %v3307_v44 = vpop.eup %3306 }
 0xb70   :  { %v2642_v46 = vmul.f32 %v3307_v44, %v36_v42 }
 0xb72   :  { %2651 = vperm.xlu1 %3024, %v2642_v46   ;;  %v2643_v47 = vmul.f32 %v2642_v46, %v2627_v35 }
 0xb74   :  { %2645 = vrot.lane.b32.xlu0 %v2643_v47, %s3311_s22 }
 0xb76   :  { %3025 = vset.pattern.permute.xlu1 %v3310_v51 }
 0xb78   :  { %489 = vperm.xlu0 %3022, %v477_v54  }
 0xbe6   :  { %v2646_v55 = vpop.permute.xlu0 %2645 }
 0xbe7   :  { %v2648_v56 = vsub.f32 %v36_v42, %v2646_v55 }
 0xbe9   :  { %2660 = vperm.xlu1 %3025, %v2648_v56  }
 0xbf1   :  { %v2652_v7 = vpop.permute.xlu1 %2651 }
 0xbf2   :  { %v2654_v9 = vmul.f32 %v2652_v7, %v4236_v20  ;;  %v2655_v10 = vmul.f32 %v2652_v7, %v4242_v16  ;;  %v2656_v13 = vmul.f32 %v2652_v7, %v4238_v25  ;;  %v2657_v5 = vmul.f32 %v2652_v7, %v4244_v18 }
 0xbf7   :  { %v490_v43 = vpop.permute.xlu0 %489 }
 0xbf8   :  { %v492_v31 = vadd.f32 %v490_v43, %v483_v58  ;;  %v493_v45 = vadd.f32 %v490_v43, %v484_v59  ;;  %v494_v62 = vadd.f32 %v490_v43, %v485_v60  ;;  %v495_v63 = vadd.f32 %v490_v43, %v486_v61 }
 0xbfa   :  { %v496_v0 = vmax.f32 %v492_v31, 0.0  ;;  %v497_v51 = vmax.f32 %v493_v45, 0.0  ;;  %v498_v1 = vmax.f32 %v494_v62, 0.0  ;;  %v499_v3 = vmax.f32 %v495_v63, 0.0 }
 0xbfc   :  { %500 = vst [vmem:[%s4305_s8] sm:$0xff] %v496_v0  ;;  %501 = vst [vmem:[%s4305_s8 + $0x8] sm:$0xff] %v497_v51 }
 0xbfd   :  { %502 = vst [vmem:[%s4305_s8 + $0x10] sm:$0xff] %v498_v1  ;;  %503 = vst [vmem:[%s4305_s8 + $0x18] sm:$0xff] %v499_v3 }
 0xc68   :  { %v2661_v14 = vpop.permute.xlu1 %2660 }
 0xc69   :  { %v2663_v33 = vadd.f32 %v2661_v14, %v2654_v9  ;;  %v2664_v38 = vadd.f32 %v2661_v14, %v2655_v10  ;;  %v2665_v15 = vadd.f32 %v2661_v14, %v2656_v13  ;;  %v2666_v2 = vadd.f32 %v2661_v14, %v2657_v5 }
 0xc6b   :  { %v2667_v6 = vmax.f32 %v2663_v33, 0.0  ;;  %v2668_v8 = vmax.f32 %v2664_v38, 0.0  ;;  %v2669_v11 = vmax.f32 %v2665_v15, 0.0  ;;  %v2670_v12 = vmax.f32 %v2666_v2, 0.0 }
 0xc6d   :  { %2671 = vst [vmem:[%s4306_s9] sm:$0xff] %v2667_v6  ;;  %2672 = vst [vmem:[%s4306_s9 + $0x8] sm:$0xff] %v2668_v8 }
 0xc6e   :  { %2673 = vst [vmem:[%s4306_s9 + $0x10] sm:$0xff] %v2669_v11  ;;  %2674 = vst [vmem:[%s4306_s9 + $0x18] sm:$0xff] %v2670_v12 }

</bundles_post_ra>
